<compile_context>
chip_gen: v5e
topology: v5e:2x2
jax: 0.10.0
libtpu: 0.0.40
codegen_flags: <defaults>
</compile_context>

<pallas_src>
import functools

import jax
import jax.numpy as jnp
from jax.experimental import pallas as pl
from jax.experimental.pallas import tpu as pltpu


# ----------------------------- Pallas kernel ------------------------------- #

def make_gin_jk_kernel(n_nodes, hidden, tile_m, tile_k):
    N, H, TM, TK = n_nodes, hidden, tile_m, tile_k

    def kernel(a_ref, x_ref, p_ref, eps_ref,
               w1_ref, s1_ref, sh1_ref, w2_ref, s2_ref, sh2_ref,
               l1w_ref, l1b_ref, l2w_ref, l2b_ref,
               o_ref,
               h_ref, agg_ref, acc_ref):
        l = pl.program_id(0)     # layer
        i = pl.program_id(1)     # node-row block
        k = pl.program_id(2)     # K block of the aggregation A @ h
        nl = pl.num_programs(0)
        ni = pl.num_programs(1)
        nk = pl.num_programs(2)

        cur = l % 2              # h double-buffer slot holding layer-l input
        nxt = 1 - cur            # slot receiving layer-l output
        cur_off = cur * N        # row offset into the flattened (2N, H) h scratch
        nxt_off = nxt * N

        # ---- one-time init: stage x into h slot 0, zero the JK accumulator ----
        @pl.when((l == 0) & (i == 0) & (k == 0))
        def _():
            h_ref[pl.ds(0, N), :] = x_ref[...]
            acc_ref[...] = jnp.zeros_like(acc_ref)

        # ---- aggregation: stream A in (TM, TK) tiles; h stays VMEM-resident ----
        @pl.when(k == 0)
        def _():
            agg_ref[...] = jnp.zeros_like(agg_ref)

        k_start = pl.multiple_of(cur_off + k * TK, 8)
        h_k = h_ref[pl.ds(k_start, TK), :]
        # Dominant matmul: bf16 x bf16 -> f32 accumulation (native MXU mode).
        agg_ref[...] += jnp.dot(a_ref[...], h_k.astype(jnp.bfloat16),
                                preferred_element_type=jnp.float32)

        # ---- finalize this row block of layer l ----
        @pl.when(k == nk - 1)
        def _():
            row_in = pl.multiple_of(cur_off + i * TM, 8)
            row_out = pl.multiple_of(nxt_off + i * TM, 8)
            h_rows = h_ref[pl.ds(row_in, TM), :]
            # (1 + eps_l) * x self term (VALU FMA, eps from SMEM — A not stacked).
            agg = agg_ref[...] + (1.0 + eps_ref[l]) * h_rows
            # GIN MLP: Linear -> BN(folded) -> ReLU -> Linear -> BN(folded) -> ReLU
            z = jnp.dot(agg, w1_ref[l], preferred_element_type=jnp.float32)
            z = jnp.maximum(z * s1_ref[l] + sh1_ref[l], 0.0)
            z = jnp.dot(z, w2_ref[l], preferred_element_type=jnp.float32)
            h_new = jnp.maximum(z * s2_ref[l] + sh2_ref[l], 0.0)
            h_ref[pl.ds(row_out, TM), :] = h_new

            # After the last row block of this layer, fold its JK contribution:
            #   acc += (P @ h_l) @ lin1_w_slab_l
            # Keep this association: costs G*N*H + G*H*H flops (G << N); do NOT
            # reassociate to P @ (h_l @ slab_l) which costs N*H*H.
            @pl.when(i == ni - 1)
            def _():
                h_full = h_ref[pl.ds(pl.multiple_of(nxt_off, 8), N), :]
                pooled = jnp.dot(p_ref[...], h_full,
                                 preferred_element_type=jnp.float32)
                acc_ref[...] += jnp.dot(pooled, l1w_ref[l],
                                        preferred_element_type=jnp.float32)

        # ---- head on the very last grid step ----
        @pl.when((l == nl - 1) & (i == ni - 1) & (k == nk - 1))
        def _():
            head = jnp.maximum(acc_ref[...] + l1b_ref[...], 0.0)
            # TODO(synk): dropout omitted — forward is run in eval mode (training=False).
            o_ref[...] = (jnp.dot(head, l2w_ref[...],
                                  preferred_element_type=jnp.float32)
                          + l2b_ref[...])

    return kernel


# ------------------------------ wrapper ------------------------------------ #

_VMEM = pl.BlockSpec(memory_space=pltpu.MemorySpace.VMEM)
_SMEM = pl.BlockSpec(memory_space=pltpu.MemorySpace.SMEM)


@functools.partial(jax.jit, static_argnames=("tile_m", "tile_k"))
def gin_with_jk_forward(x, A, P, layer_params, lin1_w, lin1_b, lin2_w, lin2_b,
                        tile_m=64, tile_k=128):
    num_layers = len(layer_params)
    n = x.shape[0]
    f_in = x.shape[1]
    hidden = layer_params[0]["w2"].shape[1]
    g = P.shape[0]
    num_classes = lin2_w.shape[1]

    # Tile sizes: last-two block dims must be multiples of (8, 128) or equal the
    # full array dims; fall back to full extents when they don't divide N.
    tm = tile_m if (n % tile_m == 0 and tile_m % 8 == 0) else n
    tk = tile_k if (n % tile_k == 0 and tile_k % 128 == 0) else n

    # Layer 0 maps f_in -> hidden; pad its input dim (and x) to `hidden` with
    # zeros so every layer shares one [H, H] weight layout and one resident h
    # buffer.  The padding is exact (padded x columns are zero).
    assert f_in <= hidden, "demo wrapper assumes num_features <= hidden"
    x_pad = jnp.pad(x, ((0, 0), (0, hidden - f_in)))
    w1_0 = jnp.pad(layer_params[0]["w1"], ((0, hidden - f_in), (0, 0)))
    w1s = jnp.stack([w1_0] + [p["w1"] for p in layer_params[1:]])
    w2s = jnp.stack([p["w2"] for p in layer_params])
    s1s = jnp.stack([p["s1"] for p in layer_params])
    sh1s = jnp.stack([p["sh1"] for p in layer_params])
    s2s = jnp.stack([p["s2"] for p in layer_params])
    sh2s = jnp.stack([p["sh2"] for p in layer_params])
    eps = jnp.concatenate([p["eps"] for p in layer_params])   # [L] SMEM scalars

    # lin1(concat) == sum_l pooled_l @ lin1_w[l*H:(l+1)*H]; pre-split the slabs
    # (no dynamic in-kernel slicing of lin1_w, no (8,128) boundary hazard).
    lin1_w3 = lin1_w.reshape(num_layers, hidden, hidden)

    # Single adjacency (no L-way stack); bf16 halves the bytes of the dominant
    # operand and feeds the MXU natively (integer edge counts are exact in bf16).
    a_bf16 = A.astype(jnp.bfloat16)

    grid = (num_layers, n // tm, n // tk)
    kernel = make_gin_jk_kernel(n, hidden, tm, tk)

    return pl.pallas_call(
        kernel,
        out_shape=jax.ShapeDtypeStruct((g, num_classes), jnp.float32),
        grid_spec=pltpu.PrefetchScalarGridSpec(
            num_scalar_prefetch=0,
            grid=grid,
            in_specs=[
                pl.BlockSpec((tm, tk), lambda l, i, k: (i, k)),  # A, streamed
                _VMEM,   # x (padded)       [N, H]
                _VMEM,   # P                [G, N]
                _SMEM,   # eps              [L]
                _VMEM, _VMEM, _VMEM,    # w1s [L,H,H], s1s [L,1,H], sh1s [L,1,H]
                _VMEM, _VMEM, _VMEM,    # w2s [L,H,H], s2s [L,1,H], sh2s [L,1,H]
                _VMEM,   # lin1_w slabs     [L, H, H]
                _VMEM,   # lin1_b           [1, H]
                _VMEM,   # lin2_w           [H, C]
                _VMEM,   # lin2_b           [1, C]
            ],
            out_specs=pl.BlockSpec((g, num_classes), lambda l, i, k: (0, 0)),
            scratch_shapes=[
                pltpu.VMEM((2 * n, hidden), jnp.float32),   # h double buffer
                pltpu.VMEM((tm, hidden), jnp.float32),      # agg accumulator
                pltpu.VMEM((g, hidden), jnp.float32),       # JK/lin1 accumulator
            ],
        ),
        # h carry across layers/row blocks -> all axes sequential ("arbitrary").
        # (vmem_limit_bytes can be raised for larger N on v5e/v6e; not needed here.)
        compiler_params=pltpu.CompilerParams(
            dimension_semantics=("arbitrary", "arbitrary", "arbitrary")),
    )(a_bf16, x_pad, P, eps, w1s, s1s, sh1s, w2s, s2s, sh2s,
      lin1_w3, lin1_b, lin2_w, lin2_b)


# --------------------------- parameter setup -------------------------------- #

def init_gin_mlp(key, fin, hidden):
    """Linear(fin,h) -> BN -> ReLU -> Linear(h,h) -> BN -> ReLU, BN folded (eval)."""
    ks = jax.random.split(key, 12)

    def bn(k0, k1, k2, k3):
        gamma = 1.0 + 0.05 * jax.random.normal(k0, (hidden,), jnp.float32)
        beta = 0.05 * jax.random.normal(k1, (hidden,), jnp.float32)
        mean = 0.05 * jax.random.normal(k2, (hidden,), jnp.float32)
        var = 1.0 + 0.1 * jax.random.uniform(k3, (hidden,), jnp.float32)
        return gamma, beta, mean, var

    w1 = 0.2 * jax.random.normal(ks[0], (fin, hidden), jnp.float32)
    b1 = 0.02 * jax.random.normal(ks[1], (hidden,), jnp.float32)
    g1, be1, m1, v1 = bn(ks[2], ks[3], ks[4], ks[5])
    w2 = 0.2 * jax.random.normal(ks[6], (hidden, hidden), jnp.float32)
    b2 = 0.02 * jax.random.normal(ks[7], (hidden,), jnp.float32)
    g2, be2, m2, v2 = bn(ks[8], ks[9], ks[10], ks[11])

    # Fold bias + eval-mode BatchNorm into per-feature scale & shift (exact).
    s1 = g1 / jnp.sqrt(v1 + 1e-5)
    sh1 = (b1 - m1) * s1 + be1
    s2 = g2 / jnp.sqrt(v2 + 1e-5)
    sh2 = (b2 - m2) * s2 + be2
    return dict(
        w1=w1, s1=s1.reshape(1, hidden), sh1=sh1.reshape(1, hidden),
        w2=w2, s2=s2.reshape(1, hidden), sh2=sh2.reshape(1, hidden),
        eps=jnp.zeros((1,), jnp.float32),   # train_eps=True -> eps param init to 0
    )


# ------------------------------- main --------------------------------------- #

if __name__ == "__main__":
    key = jax.random.PRNGKey(0)
    N, G = 256, 2                 # 256 nodes split over 2 graphs of 128
    F_IN, HIDDEN = 16, 32
    NUM_LAYERS, NUM_CLASSES = 3, 8
    EDGES_PER_GRAPH = 512

    k_x, k_e0s, k_e0d, k_e1s, k_e1d, k_p = jax.random.split(key, 6)

    # Node features.
    x = jax.random.normal(k_x, (N, F_IN), jnp.float32)

    # Random intra-graph edges; graph 0 = nodes [0,128), graph 1 = nodes [128,256).
    half = N // 2
    src0 = jax.random.randint(k_e0s, (EDGES_PER_GRAPH,), 0, half)
    dst0 = jax.random.randint(k_e0d, (EDGES_PER_GRAPH,), 0, half)
    src1 = jax.random.randint(k_e1s, (EDGES_PER_GRAPH,), half, N)
    dst1 = jax.random.randint(k_e1d, (EDGES_PER_GRAPH,), half, N)
    src = jnp.concatenate([src0, src1])
    dst = jnp.concatenate([dst0, dst1])

    # Dense adjacency for the scatter-add message passing: A[dst, src] += 1.
    # TODO(synk): for realistic sparse graphs, replace the dense N^2 aggregation
    # with a CSR / scalar-prefetch design that skips empty tiles.
    A = jnp.zeros((N, N), jnp.float32).at[dst, src].add(1.0)

    # Graph assignment -> one-hot pooling matrix P [G, N] (sum readout).
    batch = jnp.concatenate([jnp.zeros((half,), jnp.int32),
                             jnp.ones((N - half,), jnp.int32)])
    P = (batch[None, :] == jnp.arange(G, dtype=jnp.int32)[:, None]).astype(jnp.float32)

    # Per-layer GIN MLP parameters (conv1: F_IN->H, rest: H->H).
    layer_keys = jax.random.split(k_p, NUM_LAYERS + 2)
    layer_params = [init_gin_mlp(layer_keys[0], F_IN, HIDDEN)]
    for i in range(1, NUM_LAYERS):
        layer_params.append(init_gin_mlp(layer_keys[i], HIDDEN, HIDDEN))

    # JK head: lin1 (num_layers*hidden -> hidden), lin2 (hidden -> num_classes).
    lin1_w = 0.1 * jax.random.normal(layer_keys[NUM_LAYERS],
                                     (NUM_LAYERS * HIDDEN, HIDDEN), jnp.float32)
    lin1_b = jnp.zeros((1, HIDDEN), jnp.float32)
    lin2_w = 0.1 * jax.random.normal(layer_keys[NUM_LAYERS + 1],
                                     (HIDDEN, NUM_CLASSES), jnp.float32)
    lin2_b = jnp.zeros((1, NUM_CLASSES), jnp.float32)

    out = gin_with_jk_forward(x, A, P, layer_params, lin1_w, lin1_b,
                              lin2_w, lin2_b, tile_m=64, tile_k=128)
    out = jax.block_until_ready(out)
    assert out.shape == (G, NUM_CLASSES)
    assert bool(jnp.all(jnp.isfinite(out)))
    print("KERNEL_OK")
</pallas_src>

<mosaic_0001>
module attributes {stable_mosaic.version = 11 : i64} {
  func.func @kernel(%arg0: i32, %arg1: i32, %arg2: i32, %arg3: memref<64x128xbf16, #tpu.memory_space<vmem>>, %arg4: memref<256x32xf32, #tpu.memory_space<vmem>>, %arg5: memref<2x256xf32, #tpu.memory_space<vmem>>, %arg6: memref<3xf32, #tpu.memory_space<smem>>, %arg7: memref<3x32x32xf32, #tpu.memory_space<vmem>>, %arg8: memref<3x1x32xf32, #tpu.memory_space<vmem>>, %arg9: memref<3x1x32xf32, #tpu.memory_space<vmem>>, %arg10: memref<3x32x32xf32, #tpu.memory_space<vmem>>, %arg11: memref<3x1x32xf32, #tpu.memory_space<vmem>>, %arg12: memref<3x1x32xf32, #tpu.memory_space<vmem>>, %arg13: memref<3x32x32xf32, #tpu.memory_space<vmem>>, %arg14: memref<1x32xf32, #tpu.memory_space<vmem>>, %arg15: memref<32x8xf32, #tpu.memory_space<vmem>>, %arg16: memref<1x8xf32, #tpu.memory_space<vmem>>, %arg17: memref<2x8xf32, #tpu.memory_space<vmem>>, %arg18: memref<512x32xf32, #tpu.memory_space<vmem>>, %arg19: memref<64x32xf32, #tpu.memory_space<vmem>>, %arg20: memref<2x32xf32, #tpu.memory_space<vmem>>) attributes {dimension_semantics = [#tpu.dimension_semantics<arbitrary>, #tpu.dimension_semantics<arbitrary>, #tpu.dimension_semantics<arbitrary>], iteration_bounds = array<i64: 3, 4, 2>, scalar_prefetch = 0 : i64, scratch_operands = 3 : i64, tpu.core_type = #tpu.core_type<tc>, window_params = [{transform_indices = @transform_0, window_bounds = array<i64: 64, 128>}, {pipeline_mode = #tpu.pipeline_mode<synchronous>, transform_indices = @transform_1, window_bounds = array<i64: 256, 32>}, {pipeline_mode = #tpu.pipeline_mode<synchronous>, transform_indices = @transform_2, window_bounds = array<i64: 2, 256>}, {transform_indices = @transform_3, window_bounds = array<i64: 3>}, {pipeline_mode = #tpu.pipeline_mode<synchronous>, transform_indices = @transform_4, window_bounds = array<i64: 3, 32, 32>}, {pipeline_mode = #tpu.pipeline_mode<synchronous>, transform_indices = @transform_5, window_bounds = array<i64: 3, 1, 32>}, {pipeline_mode = #tpu.pipeline_mode<synchronous>, transform_indices = @transform_6, window_bounds = array<i64: 3, 1, 32>}, {pipeline_mode = #tpu.pipeline_mode<synchronous>, transform_indices = @transform_7, window_bounds = array<i64: 3, 32, 32>}, {pipeline_mode = #tpu.pipeline_mode<synchronous>, transform_indices = @transform_8, window_bounds = array<i64: 3, 1, 32>}, {pipeline_mode = #tpu.pipeline_mode<synchronous>, transform_indices = @transform_9, window_bounds = array<i64: 3, 1, 32>}, {pipeline_mode = #tpu.pipeline_mode<synchronous>, transform_indices = @transform_10, window_bounds = array<i64: 3, 32, 32>}, {pipeline_mode = #tpu.pipeline_mode<synchronous>, transform_indices = @transform_11, window_bounds = array<i64: 1, 32>}, {pipeline_mode = #tpu.pipeline_mode<synchronous>, transform_indices = @transform_12, window_bounds = array<i64: 32, 8>}, {pipeline_mode = #tpu.pipeline_mode<synchronous>, transform_indices = @transform_13, window_bounds = array<i64: 1, 8>}, {pipeline_mode = #tpu.pipeline_mode<synchronous>, transform_indices = @transform_14, window_bounds = array<i64: 2, 8>}]} {
    %c2_i32 = arith.constant 2 : i32
    %c0_i32 = arith.constant 0 : i32
    %0 = arith.cmpi eq, %c2_i32, %c0_i32 : i32
    %c1_i32 = arith.constant 1 : i32
    %1 = arith.select %0, %c1_i32, %c2_i32 : i32
    %2 = arith.remsi %arg0, %1 : i32
    %c0_i32_0 = arith.constant 0 : i32
    %3 = arith.cmpi ne, %2, %c0_i32_0 : i32
    %c0_i32_1 = arith.constant 0 : i32
    %4 = arith.cmpi slt, %2, %c0_i32_1 : i32
    %c0_i32_2 = arith.constant 0 : i32
    %5 = arith.cmpi slt, %1, %c0_i32_2 : i32
    %6 = arith.xori %4, %5 : i1
    %7 = arith.andi %6, %3 : i1
    %8 = arith.addi %2, %1 : i32
    %9 = arith.select %7, %8, %2 : i32
    %c1_i32_3 = arith.constant 1 : i32
    %10 = arith.subi %c1_i32_3, %9 : i32
    %c256_i32 = arith.constant 256 : i32
    %11 = arith.muli %9, %c256_i32 : i32
    %c256_i32_4 = arith.constant 256 : i32
    %12 = arith.muli %10, %c256_i32_4 : i32
    %c0_i32_5 = arith.constant 0 : i32
    %13 = arith.cmpi eq, %arg0, %c0_i32_5 : i32
    %c0_i32_6 = arith.constant 0 : i32
    %14 = arith.cmpi eq, %arg1, %c0_i32_6 : i32
    %15 = arith.andi %13, %14 : i1
    %c0_i32_7 = arith.constant 0 : i32
    %16 = arith.cmpi eq, %arg2, %c0_i32_7 : i32
    %17 = arith.andi %15, %16 : i1
    %18 = arith.extui %17 : i1 to i32
    %c0_i32_8 = arith.constant 0 : i32
    %19 = arith.cmpi ne, %18, %c0_i32_8 : i32
    scf.if %19 {
      %c0_22 = arith.constant 0 : index
      %c0_23 = arith.constant 0 : index
      %44 = vector.load %arg4[%c0_22, %c0_23] : memref<256x32xf32, #tpu.memory_space<vmem>>, vector<256x32xf32>
      %c0_24 = arith.constant 0 : index
      %c0_25 = arith.constant 0 : index
      %45 = vector.load %arg18[%c0_24, %c0_25] : memref<512x32xf32, #tpu.memory_space<vmem>>, vector<256x32xf32>
      tpu.vector_store %arg18[%c0_24, %c0_25], %44 {strides = array<i32>} : memref<512x32xf32, #tpu.memory_space<vmem>>, vector<256x32xf32>,
      %cst_26 = arith.constant 0.000000e+00 : f32
      %46 = vector.broadcast %cst_26 : f32 to vector<2x32xf32>
      %c0_27 = arith.constant 0 : index
      %c0_28 = arith.constant 0 : index
      %47 = vector.load %arg20[%c0_27, %c0_28] : memref<2x32xf32, #tpu.memory_space<vmem>>, vector<2x32xf32>
      tpu.vector_store %arg20[%c0_27, %c0_28], %46 {strides = array<i32>} : memref<2x32xf32, #tpu.memory_space<vmem>>, vector<2x32xf32>,
    } else {
    }
    %c0_i32_9 = arith.constant 0 : i32
    %20 = arith.cmpi eq, %arg2, %c0_i32_9 : i32
    %21 = arith.extui %20 : i1 to i32
    %c0_i32_10 = arith.constant 0 : i32
    %22 = arith.cmpi ne, %21, %c0_i32_10 : i32
    scf.if %22 {
      %cst_22 = arith.constant 0.000000e+00 : f32
      %44 = vector.broadcast %cst_22 : f32 to vector<64x32xf32>
      %c0_23 = arith.constant 0 : index
      %c0_24 = arith.constant 0 : index
      %45 = vector.load %arg19[%c0_23, %c0_24] : memref<64x32xf32, #tpu.memory_space<vmem>>, vector<64x32xf32>
      tpu.vector_store %arg19[%c0_23, %c0_24], %44 {strides = array<i32>} : memref<64x32xf32, #tpu.memory_space<vmem>>, vector<64x32xf32>,
    } else {
    }
    %c128_i32 = arith.constant 128 : i32
    %23 = arith.muli %arg2, %c128_i32 : i32
    %24 = arith.addi %11, %23 : i32
    %25 = tpu.assume_multiple %24, 8 : i32
    %26 = arith.index_cast %25 : i32 to index
    %c0 = arith.constant 0 : index
    %27 = vector.load %arg18[%26, %c0] : memref<512x32xf32, #tpu.memory_space<vmem>>, vector<128x32xf32>
    %c0_11 = arith.constant 0 : index
    %c0_12 = arith.constant 0 : index
    %28 = vector.load %arg19[%c0_11, %c0_12] : memref<64x32xf32, #tpu.memory_space<vmem>>, vector<64x32xf32>
    %c0_13 = arith.constant 0 : index
    %c0_14 = arith.constant 0 : index
    %29 = vector.load %arg3[%c0_13, %c0_14] : memref<64x128xbf16, #tpu.memory_space<vmem>>, vector<64x128xbf16>
    %30 = arith.truncf %27 : vector<128x32xf32> to vector<128x32xbf16>
    %cst = arith.constant dense<0.000000e+00> : vector<64x32xf32>
    %31 = tpu.matmul %29, %30, %cst {dimension_numbers = #tpu.dot_dimension_numbers<[1], [0], [0], [1], [0, 0, 1, 1], [], []>} : vector<64x128xbf16>, vector<128x32xbf16>, vector<64x32xf32> -> vector<64x32xf32>
    %32 = arith.addf %28, %31 : vector<64x32xf32>
    %c0_15 = arith.constant 0 : index
    %c0_16 = arith.constant 0 : index
    %33 = vector.load %arg19[%c0_15, %c0_16] : memref<64x32xf32, #tpu.memory_space<vmem>>, vector<64x32xf32>
    tpu.vector_store %arg19[%c0_15, %c0_16], %32 {strides = array<i32>} : memref<64x32xf32, #tpu.memory_space<vmem>>, vector<64x32xf32>,
    %c1_i32_17 = arith.constant 1 : i32
    %34 = arith.cmpi eq, %arg2, %c1_i32_17 : i32
    %35 = arith.extui %34 : i1 to i32
    %c0_i32_18 = arith.constant 0 : i32
    %36 = arith.cmpi ne, %35, %c0_i32_18 : i32
    scf.if %36 {
      %c64_i32 = arith.constant 64 : i32
      %44 = arith.muli %arg1, %c64_i32 : i32
      %45 = arith.addi %11, %44 : i32
      %46 = tpu.assume_multiple %45, 8 : i32
      %c64_i32_22 = arith.constant 64 : i32
      %47 = arith.muli %arg1, %c64_i32_22 : i32
      %48 = arith.addi %12, %47 : i32
      %49 = tpu.assume_multiple %48, 8 : i32
      %50 = arith.index_cast %46 : i32 to index
      %c0_23 = arith.constant 0 : index
      %51 = vector.load %arg18[%50, %c0_23] : memref<512x32xf32, #tpu.memory_space<vmem>>, vector<64x32xf32>
      %c0_24 = arith.constant 0 : index
      %c0_25 = arith.constant 0 : index
      %52 = vector.load %arg19[%c0_24, %c0_25] : memref<64x32xf32, #tpu.memory_space<vmem>>, vector<64x32xf32>
      %53 = arith.index_cast %arg0 : i32 to index
      %54 = memref.load %arg6[%53] : memref<3xf32, #tpu.memory_space<smem>>
      %cst_26 = arith.constant 1.000000e+00 : f32
      %55 = arith.addf %cst_26, %54 : f32
      %56 = vector.broadcast %55 : f32 to vector<64x32xf32>
      %57 = arith.mulf %56, %51 : vector<64x32xf32>
      %58 = arith.addf %52, %57 : vector<64x32xf32>
      %59 = arith.index_cast %arg0 : i32 to index
      %c0_27 = arith.constant 0 : index
      %c0_28 = arith.constant 0 : index
      %60 = vector.load %arg7[%59, %c0_27, %c0_28] : memref<3x32x32xf32, #tpu.memory_space<vmem>>, vector<1x32x32xf32>
      %61 = vector.shape_cast %60 : vector<1x32x32xf32> to vector<32x32xf32>
      %cst_29 = arith.constant dense<0.000000e+00> : vector<64x32xf32>
      %62 = tpu.matmul %58, %61, %cst_29 {dimension_numbers = #tpu.dot_dimension_numbers<[1], [0], [0], [1], [0, 0, 1, 1], [], []>} : vector<64x32xf32>, vector<32x32xf32>, vector<64x32xf32> -> vector<64x32xf32>
      %63 = arith.index_cast %arg0 : i32 to index
      %c0_30 = arith.constant 0 : index
      %c0_31 = arith.constant 0 : index
      %64 = vector.load %arg8[%63, %c0_30, %c0_31] : memref<3x1x32xf32, #tpu.memory_space<vmem>>, vector<1x1x32xf32>
      %65 = vector.shape_cast %64 : vector<1x1x32xf32> to vector<1x32xf32>
      %66 = vector.broadcast %65 : vector<1x32xf32> to vector<64x32xf32>
      %67 = arith.mulf %62, %66 : vector<64x32xf32>
      %68 = arith.index_cast %arg0 : i32 to index
      %c0_32 = arith.constant 0 : index
      %c0_33 = arith.constant 0 : index
      %69 = vector.load %arg9[%68, %c0_32, %c0_33] : memref<3x1x32xf32, #tpu.memory_space<vmem>>, vector<1x1x32xf32>
      %70 = vector.shape_cast %69 : vector<1x1x32xf32> to vector<1x32xf32>
      %71 = vector.broadcast %70 : vector<1x32xf32> to vector<64x32xf32>
      %72 = arith.addf %67, %71 : vector<64x32xf32>
      %cst_34 = arith.constant 0.000000e+00 : f32
      %73 = vector.broadcast %cst_34 : f32 to vector<64x32xf32>
      %74 = arith.maximumf %72, %73 : vector<64x32xf32>
      %75 = arith.index_cast %arg0 : i32 to index
      %c0_35 = arith.constant 0 : index
      %c0_36 = arith.constant 0 : index
      %76 = vector.load %arg10[%75, %c0_35, %c0_36] : memref<3x32x32xf32, #tpu.memory_space<vmem>>, vector<1x32x32xf32>
      %77 = vector.shape_cast %76 : vector<1x32x32xf32> to vector<32x32xf32>
      %cst_37 = arith.constant dense<0.000000e+00> : vector<64x32xf32>
      %78 = tpu.matmul %74, %77, %cst_37 {dimension_numbers = #tpu.dot_dimension_numbers<[1], [0], [0], [1], [0, 0, 1, 1], [], []>} : vector<64x32xf32>, vector<32x32xf32>, vector<64x32xf32> -> vector<64x32xf32>
      %79 = arith.index_cast %arg0 : i32 to index
      %c0_38 = arith.constant 0 : index
      %c0_39 = arith.constant 0 : index
      %80 = vector.load %arg11[%79, %c0_38, %c0_39] : memref<3x1x32xf32, #tpu.memory_space<vmem>>, vector<1x1x32xf32>
      %81 = vector.shape_cast %80 : vector<1x1x32xf32> to vector<1x32xf32>
      %82 = vector.broadcast %81 : vector<1x32xf32> to vector<64x32xf32>
      %83 = arith.mulf %78, %82 : vector<64x32xf32>
      %84 = arith.index_cast %arg0 : i32 to index
      %c0_40 = arith.constant 0 : index
      %c0_41 = arith.constant 0 : index
      %85 = vector.load %arg12[%84, %c0_40, %c0_41] : memref<3x1x32xf32, #tpu.memory_space<vmem>>, vector<1x1x32xf32>
      %86 = vector.shape_cast %85 : vector<1x1x32xf32> to vector<1x32xf32>
      %87 = vector.broadcast %86 : vector<1x32xf32> to vector<64x32xf32>
      %88 = arith.addf %83, %87 : vector<64x32xf32>
      %cst_42 = arith.constant 0.000000e+00 : f32
      %89 = vector.broadcast %cst_42 : f32 to vector<64x32xf32>
      %90 = arith.maximumf %88, %89 : vector<64x32xf32>
      %91 = arith.index_cast %49 : i32 to index
      %c0_43 = arith.constant 0 : index
      %92 = vector.load %arg18[%91, %c0_43] : memref<512x32xf32, #tpu.memory_space<vmem>>, vector<64x32xf32>
      tpu.vector_store %arg18[%91, %c0_43], %90 {strides = array<i32>} : memref<512x32xf32, #tpu.memory_space<vmem>>, vector<64x32xf32>,
      %c3_i32_44 = arith.constant 3 : i32
      %93 = arith.cmpi eq, %arg1, %c3_i32_44 : i32
      %94 = arith.extui %93 : i1 to i32
      %c0_i32_45 = arith.constant 0 : i32
      %95 = arith.cmpi ne, %94, %c0_i32_45 : i32
      scf.if %95 {
        %96 = tpu.assume_multiple %12, 8 : i32
        %97 = arith.index_cast %96 : i32 to index
        %c0_46 = arith.constant 0 : index
        %98 = vector.load %arg18[%97, %c0_46] : memref<512x32xf32, #tpu.memory_space<vmem>>, vector<256x32xf32>
        %c0_47 = arith.constant 0 : index
        %c0_48 = arith.constant 0 : index
        %99 = vector.load %arg5[%c0_47, %c0_48] : memref<2x256xf32, #tpu.memory_space<vmem>>, vector<2x256xf32>
        %cst_49 = arith.constant dense<0.000000e+00> : vector<2x32xf32>
        %100 = tpu.matmul %99, %98, %cst_49 {dimension_numbers = #tpu.dot_dimension_numbers<[1], [0], [0], [1], [0, 0, 1, 1], [], []>} : vector<2x256xf32>, vector<256x32xf32>, vector<2x32xf32> -> vector<2x32xf32>
        %c0_50 = arith.constant 0 : index
        %c0_51 = arith.constant 0 : index
        %101 = vector.load %arg20[%c0_50, %c0_51] : memref<2x32xf32, #tpu.memory_space<vmem>>, vector<2x32xf32>
        %102 = arith.index_cast %arg0 : i32 to index
        %c0_52 = arith.constant 0 : index
        %c0_53 = arith.constant 0 : index
        %103 = vector.load %arg13[%102, %c0_52, %c0_53] : memref<3x32x32xf32, #tpu.memory_space<vmem>>, vector<1x32x32xf32>
        %104 = vector.shape_cast %103 : vector<1x32x32xf32> to vector<32x32xf32>
        %cst_54 = arith.constant dense<0.000000e+00> : vector<2x32xf32>
        %105 = tpu.matmul %100, %104, %cst_54 {dimension_numbers = #tpu.dot_dimension_numbers<[1], [0], [0], [1], [0, 0, 1, 1], [], []>} : vector<2x32xf32>, vector<32x32xf32>, vector<2x32xf32> -> vector<2x32xf32>
        %106 = arith.addf %101, %105 : vector<2x32xf32>
        %c0_55 = arith.constant 0 : index
        %c0_56 = arith.constant 0 : index
        %107 = vector.load %arg20[%c0_55, %c0_56] : memref<2x32xf32, #tpu.memory_space<vmem>>, vector<2x32xf32>
        tpu.vector_store %arg20[%c0_55, %c0_56], %106 {strides = array<i32>} : memref<2x32xf32, #tpu.memory_space<vmem>>, vector<2x32xf32>,
      } else {
      }
    } else {
    }
    %c2_i32_19 = arith.constant 2 : i32
    %37 = arith.cmpi eq, %arg0, %c2_i32_19 : i32
    %c3_i32 = arith.constant 3 : i32
    %38 = arith.cmpi eq, %arg1, %c3_i32 : i32
    %39 = arith.andi %37, %38 : i1
    %c1_i32_20 = arith.constant 1 : i32
    %40 = arith.cmpi eq, %arg2, %c1_i32_20 : i32
    %41 = arith.andi %39, %40 : i1
    %42 = arith.extui %41 : i1 to i32
    %c0_i32_21 = arith.constant 0 : i32
    %43 = arith.cmpi ne, %42, %c0_i32_21 : i32
    scf.if %43 {
      %c0_22 = arith.constant 0 : index
      %c0_23 = arith.constant 0 : index
      %44 = vector.load %arg20[%c0_22, %c0_23] : memref<2x32xf32, #tpu.memory_space<vmem>>, vector<2x32xf32>
      %c0_24 = arith.constant 0 : index
      %c0_25 = arith.constant 0 : index
      %45 = vector.load %arg14[%c0_24, %c0_25] : memref<1x32xf32, #tpu.memory_space<vmem>>, vector<1x32xf32>
      %46 = vector.broadcast %45 : vector<1x32xf32> to vector<2x32xf32>
      %47 = arith.addf %44, %46 : vector<2x32xf32>
      %cst_26 = arith.constant 0.000000e+00 : f32
      %48 = vector.broadcast %cst_26 : f32 to vector<2x32xf32>
      %49 = arith.maximumf %47, %48 : vector<2x32xf32>
      %c0_27 = arith.constant 0 : index
      %c0_28 = arith.constant 0 : index
      %50 = vector.load %arg15[%c0_27, %c0_28] : memref<32x8xf32, #tpu.memory_space<vmem>>, vector<32x8xf32>
      %cst_29 = arith.constant dense<0.000000e+00> : vector<2x8xf32>
      %51 = tpu.matmul %49, %50, %cst_29 {dimension_numbers = #tpu.dot_dimension_numbers<[1], [0], [0], [1], [0, 0, 1, 1], [], []>} : vector<2x32xf32>, vector<32x8xf32>, vector<2x8xf32> -> vector<2x8xf32>
      %c0_30 = arith.constant 0 : index
      %c0_31 = arith.constant 0 : index
      %52 = vector.load %arg16[%c0_30, %c0_31] : memref<1x8xf32, #tpu.memory_space<vmem>>, vector<1x8xf32>
      %53 = vector.broadcast %52 : vector<1x8xf32> to vector<2x8xf32>
      %54 = arith.addf %51, %53 : vector<2x8xf32>
      %c0_32 = arith.constant 0 : index
      %c0_33 = arith.constant 0 : index
      %55 = vector.load %arg17[%c0_32, %c0_33] : memref<2x8xf32, #tpu.memory_space<vmem>>, vector<2x8xf32>
      tpu.vector_store %arg17[%c0_32, %c0_33], %54 {strides = array<i32>} : memref<2x8xf32, #tpu.memory_space<vmem>>, vector<2x8xf32>,
    } else {
    }
    return
  }
  func.func @transform_0(%arg0: i32, %arg1: i32, %arg2: i32) -> (i32, i32) {
    %c0_i32 = arith.constant 0 : i32
    return %arg1, %arg2 : i32, i32
  }
  func.func @transform_1(%arg0: i32, %arg1: i32, %arg2: i32) -> (i32, i32) {
    %c0_i32 = arith.constant 0 : i32
    %c0_i32_0 = arith.constant 0 : i32
    %c0_i32_1 = arith.constant 0 : i32
    return %c0_i32, %c0_i32_0 : i32, i32
  }
  func.func @transform_2(%arg0: i32, %arg1: i32, %arg2: i32) -> (i32, i32) {
    %c0_i32 = arith.constant 0 : i32
    %c0_i32_0 = arith.constant 0 : i32
    %c0_i32_1 = arith.constant 0 : i32
    return %c0_i32, %c0_i32_0 : i32, i32
  }
  func.func @transform_3(%arg0: i32, %arg1: i32, %arg2: i32) -> i32 {
    %c0_i32 = arith.constant 0 : i32
    %c0_i32_0 = arith.constant 0 : i32
    return %c0_i32 : i32
  }
  func.func @transform_4(%arg0: i32, %arg1: i32, %arg2: i32) -> (i32, i32, i32) {
    %c0_i32 = arith.constant 0 : i32
    %c0_i32_0 = arith.constant 0 : i32
    %c0_i32_1 = arith.constant 0 : i32
    %c0_i32_2 = arith.constant 0 : i32
    return %c0_i32, %c0_i32_0, %c0_i32_1 : i32, i32, i32
  }
  func.func @transform_5(%arg0: i32, %arg1: i32, %arg2: i32) -> (i32, i32, i32) {
    %c0_i32 = arith.constant 0 : i32
    %c0_i32_0 = arith.constant 0 : i32
    %c0_i32_1 = arith.constant 0 : i32
    %c0_i32_2 = arith.constant 0 : i32
    return %c0_i32, %c0_i32_0, %c0_i32_1 : i32, i32, i32
  }
  func.func @transform_6(%arg0: i32, %arg1: i32, %arg2: i32) -> (i32, i32, i32) {
    %c0_i32 = arith.constant 0 : i32
    %c0_i32_0 = arith.constant 0 : i32
    %c0_i32_1 = arith.constant 0 : i32
    %c0_i32_2 = arith.constant 0 : i32
    return %c0_i32, %c0_i32_0, %c0_i32_1 : i32, i32, i32
  }
  func.func @transform_7(%arg0: i32, %arg1: i32, %arg2: i32) -> (i32, i32, i32) {
    %c0_i32 = arith.constant 0 : i32
    %c0_i32_0 = arith.constant 0 : i32
    %c0_i32_1 = arith.constant 0 : i32
    %c0_i32_2 = arith.constant 0 : i32
    return %c0_i32, %c0_i32_0, %c0_i32_1 : i32, i32, i32
  }
  func.func @transform_8(%arg0: i32, %arg1: i32, %arg2: i32) -> (i32, i32, i32) {
    %c0_i32 = arith.constant 0 : i32
    %c0_i32_0 = arith.constant 0 : i32
    %c0_i32_1 = arith.constant 0 : i32
    %c0_i32_2 = arith.constant 0 : i32
    return %c0_i32, %c0_i32_0, %c0_i32_1 : i32, i32, i32
  }
  func.func @transform_9(%arg0: i32, %arg1: i32, %arg2: i32) -> (i32, i32, i32) {
    %c0_i32 = arith.constant 0 : i32
    %c0_i32_0 = arith.constant 0 : i32
    %c0_i32_1 = arith.constant 0 : i32
    %c0_i32_2 = arith.constant 0 : i32
    return %c0_i32, %c0_i32_0, %c0_i32_1 : i32, i32, i32
  }
  func.func @transform_10(%arg0: i32, %arg1: i32, %arg2: i32) -> (i32, i32, i32) {
    %c0_i32 = arith.constant 0 : i32
    %c0_i32_0 = arith.constant 0 : i32
    %c0_i32_1 = arith.constant 0 : i32
    %c0_i32_2 = arith.constant 0 : i32
    return %c0_i32, %c0_i32_0, %c0_i32_1 : i32, i32, i32
  }
  func.func @transform_11(%arg0: i32, %arg1: i32, %arg2: i32) -> (i32, i32) {
    %c0_i32 = arith.constant 0 : i32
    %c0_i32_0 = arith.constant 0 : i32
    %c0_i32_1 = arith.constant 0 : i32
    return %c0_i32, %c0_i32_0 : i32, i32
  }
  func.func @transform_12(%arg0: i32, %arg1: i32, %arg2: i32) -> (i32, i32) {
    %c0_i32 = arith.constant 0 : i32
    %c0_i32_0 = arith.constant 0 : i32
    %c0_i32_1 = arith.constant 0 : i32
    return %c0_i32, %c0_i32_0 : i32, i32
  }
  func.func @transform_13(%arg0: i32, %arg1: i32, %arg2: i32) -> (i32, i32) {
    %c0_i32 = arith.constant 0 : i32
    %c0_i32_0 = arith.constant 0 : i32
    %c0_i32_1 = arith.constant 0 : i32
    return %c0_i32, %c0_i32_0 : i32, i32
  }
  func.func @transform_14(%arg0: i32, %arg1: i32, %arg2: i32) -> (i32, i32) {
    %c0_i32 = arith.constant 0 : i32
    %c0_i32_0 = arith.constant 0 : i32
    %c0_i32_1 = arith.constant 0 : i32
    return %c0_i32, %c0_i32_0 : i32, i32
  }
}

</mosaic_0001>

<bundles_post_ra>
// kernel: gin_with_jk_forward.1
= control target key start
LH: loop header
LB: loop body
LE: loop exit
PB: predicated region body
PF: predicated region fallthrough
CT: control target
= control target key end

     0   :  { %s2202_s0 = inlined_call_operand.vmem [shape: bf16[256,256], index: 0, kind: input, shape index: {}]   ;;  %s2203_s1 = inlined_call_operand.vmem [shape: f32[256,32], index: 1, kind: input, shape index: {}]   ;;  %s2204_s2 = inlined_call_operand.vmem [shape: f32[2,256], index: 2, kind: input, shape index: {}]   ;;  %s2205_s3 = inlined_call_operand.vmem [shape: f32[3], index: 3, kind: input, shape index: {}]   ;;  %s2206_s4 = inlined_call_operand.vmem [shape: f32[3,32,32], index: 4, kind: input, shape index: {}]   ;;  %s2207_s5 = inlined_call_operand.vmem [shape: f32[3,1,32], index: 5, kind: input, shape index: {}]   ;;  %s2208_s6 = inlined_call_operand.vmem [shape: f32[3,1,32], index: 6, kind: input, shape index: {}]   ;;  %s2209_s7 = inlined_call_operand.vmem [shape: f32[3,32,32], index: 7, kind: input, shape index: {}]   ;;  %s2210_s8 = inlined_call_operand.vmem [shape: f32[3,1,32], index: 8, kind: input, shape index: {}]   ;;  %s2211_s9 = inlined_call_operand.vmem [shape: f32[3,1,32], index: 9, kind: input, shape index: {}]   ;;  %s2212_s10 = inlined_call_operand.vmem [shape: f32[3,32,32], index: 10, kind: input, shape index: {}]   ;;  %s2213_s11 = inlined_call_operand.vmem [shape: f32[1,32], index: 11, kind: input, shape index: {}]   ;;  %s2214_s12 = inlined_call_operand.vmem [shape: f32[32,8], index: 12, kind: input, shape index: {}]   ;;  %s2215_s13 = inlined_call_operand.vmem [shape: f32[1,8], index: 13, kind: input, shape index: {}]   ;;  %s2216_s14 = inlined_call_operand.hbm [shape: f32[2,8], index: 14, kind: output, shape index: {}]  }
   0x1   :  { %2222 = sst [smem:[#allocation17_spill]] %s2205_s3 }
   0x2   :  { %2223 = sst [smem:[#allocation18_spill]] %s2213_s11 }
   0x3   :  { %2224 = sst [smem:[#allocation19_spill]] %s2214_s12 }
   0x4   :  { %2225 = sst [smem:[#allocation20_spill]] %s2215_s13 }
   0x5   :  { %2226 = sst [smem:[#allocation21_spill]] %s2216_s14 }
   0x6   :  { %19 = vsyncpa [#allocation8], 0 }
   0x7   :  { %20 = vsyncpa [#allocation7], 0  ;;  %s1712_s29 = smov 0   ;;  %s1714_s30 = smov 0  }
   0x8   :  { %s1716_s15 = smov 0   ;;  %s1718_s16 = smov 0  }
   0x9   :  { %s1720_s17 = smov 0   ;;  %s1722_s18 = smov 0  }
   0xa   :  { %s1724_s19 = smov 0   ;;  %s1726_s20 = smov 0  }
   0xb   :  { %s1728_s21 = smov 0  }
   0xc LB: > { %2227 = sst [smem:[#allocation12_spill]] %s1627_s20  ;;  %s38_s23 = sadd.s32 1, %s1619_s18  ;;  %s1631_s21 = sphi %s1728_s21, %s26_s21   ;;  %s1627_s20 = sphi %s1726_s20, %s2248_s20   ;;  %s1623_s19 = sphi %s1724_s19, %s2254_s19   ;;  %s1619_s18 = sphi %s1722_s18, %s2253_s18   ;;  %s1615_s17 = sphi %s1720_s17, %s2245_s17   ;;  %s1611_s16 = sphi %s1718_s16, %s2252_s16   ;;  %s1607_s15 = sphi %s1716_s15, %s2251_s15   ;;  %s1603_s30 = sphi %s1714_s30, %s2250_s30   ;;  %s1599_s29 = sphi %s1712_s29, %s2249_s29  }
   0xd   : > { %p39_p0 = scmp.ge.s32.totalorder %s38_s23, 2  ;;  %s41_s24 = sadd.s32 1, %s1623_s19 }
   0xe   : > { %s45_s25 = sadd.s32 1, %s1627_s20  ;;  %s54_s26 = sadd.s32 1, %s1603_s30 }
   0xf   : > { %s2256_s23 = smov (%p39_p0, %s38_s23), 0  ;;  %s2258_s24 = smov (!%p39_p0, %s41_s24), %s1623_s19 }
  0x10   : > { %2228 = sst [smem:[#allocation13_spill]] %s2256_s23  ;;  %s50_s27 = ssub.s32 %s1619_s18, %s2256_s23 }
  0x11   : > { %p61_p1 = scmp.ne.s32.totalorder %s1603_s30, %s1599_s29  ;;  %p43_p2 = scmp.ge.s32.totalorder %s2258_s24, 4 }
  0x12   : > { %p62_p3 = scmp.eq.s32.totalorder %s1631_s21, 0  ;;  %p1316_p4 = scmp.ge.s32.totalorder %s1631_s21, 1 }
  0x13   : > { %p372_p5 = scmp.lt.s32.totalorder %s1631_s21, 25  ;;  %s2260_s24 = smov (%p43_p2, %s2258_s24), 0 }
  0x14   : > { %2229 = sst [smem:[#allocation14_spill]] %s2260_s24  ;;  %s2262_s25 = smov (!%p43_p2, %s45_s25), %s1627_s20 }
  0x15   : > { %s49_s28 = ssub.s32 %s1623_s19, %s2260_s24  ;;  %p1777_p6 = por %p62_p3, %p61_p1 }
  0x16   : > { %p47_p7 = scmp.ge.s32.totalorder %s2262_s25, 3  ;;  %s51_s14 = sor.u32 %s50_s27, %s49_s28 }
  0x17   : > { %p52_p8 = scmp.eq.s32.totalorder %s51_s14, 0  ;;  %p1781_p9 = pnand %p1316_p4, %p372_p5 }
  0x18   : > { %s2264_s25 = smov (%p47_p7, %s2262_s25), 0  ;;  %s2234_s20 = sadd.s32 4294967295, %s1631_s21  }
  0x19   : > { %2232 = sst [smem:[#allocation15_spill]] %s2264_s25  ;;  %p1420_p10 = pneg %p1781_p9 }
  0x1a   : > { %s1788_s13 = scalar_select %p52_p8, %s1603_s30, %s54_s26  }
  0x1b   : > { %p1794_p11 = scmp.eq.s32.totalorder %s2234_s20, 0  ;;  %s2236_s3 = sld [smem:[#allocation17_spill]] }
  0x1c   : > { %2233 = sst [smem:[#allocation16_spill]] %s1788_s13  ;;  %s1633_s27 = smov [#allocation6]  }
  0x1d   : > { %p1421_p12 = pnand %p1794_p11, %p1420_p10  ;;  %p1318_p13 = scmp.ge.s32.totalorder %s1631_s21, 24 }
  0x1f   : > { %427 = sbr.rel (%p1318_p13) target bundleno = 50 (0x32), region = 68 }
  0x21   : > { %s390_s14 = sshll.u32 %s2236_s3, 4  ;;  %s391_s14 = int_to_ptr.vmem [resolvable:$true] %s390_s14 }
  0x22   : > { %1423 = dma.vmem_to_smem (!%p1421_p12), %s391_s14, 16, %s1633_s27, [#allocation8]  }
  0x24   : > { %430 = sbr.rel (!%p1777_p6) target bundleno = 50 (0x32), region = 72  ;;  %s432_s20 = sand.u32 (%p1777_p6), 1, %s1603_s30  }
  0x25   : > { %s1375_s26 = sshll.u32 (%p1777_p6), %s1623_s19, 4  ;;  %s1319_s28 = sshll.u32 (%p1777_p6), %s432_s20, 5 }
  0x26   : > { %s437_s11 = sadd.s32 (%p1777_p6), %s1619_s18, %s1375_s26  ;;  %s434_s14 = scalar_lea.vmem (%p1777_p6), [#allocation5], %s1319_s28 }
  0x27   : > { %s1322_s12 = sshll.u32 (%p1777_p6), %s437_s11, 2 }
  0x28   : > { %s439_s13 = scalar_lea.vmem (%p1777_p6), %s2202_s0, %s1322_s12 }
  0x29   : > { %v456_v0 = vld [vmem:[%s439_s13] sm:$0xf]  ;;  %v458_v1 = vld [vmem:[%s439_s13 + $0x8] sm:$0xf]  ;;  %v460_v2 = vld [vmem:[%s439_s13 + $0x10] sm:$0xf] }
  0x2a   : > { %457 = vst [vmem:[%s434_s14] sm:$0xf] %v456_v0  ;;  %v462_v3 = vld [vmem:[%s439_s13 + $0x18] sm:$0xf]  ;;  %v464_v4 = vld [vmem:[%s439_s13 + $0x20] sm:$0xf] }
  0x2b   : > { %459 = vst [vmem:[%s434_s14 + $0x4] sm:$0xf] %v458_v1  ;;  %v466_v5 = vld [vmem:[%s439_s13 + $0x28] sm:$0xf]  ;;  %v468_v6 = vld [vmem:[%s439_s13 + $0x30] sm:$0xf] }
  0x2c   : > { %461 = vst [vmem:[%s434_s14 + $0x8] sm:$0xf] %v460_v2  ;;  %v470_v7 = vld [vmem:[%s439_s13 + $0x38] sm:$0xf] }
  0x2d   : > { %463 = vst [vmem:[%s434_s14 + $0xc] sm:$0xf] %v462_v3 }
  0x2e   : > { %465 = vst [vmem:[%s434_s14 + $0x10] sm:$0xf] %v464_v4 }
  0x2f   : > { %467 = vst [vmem:[%s434_s14 + $0x14] sm:$0xf] %v466_v5 }
  0x30   : > { %469 = vst [vmem:[%s434_s14 + $0x18] sm:$0xf] %v468_v6 }
  0x31   : > { %471 = vst [vmem:[%s434_s14 + $0x1c] sm:$0xf] %v470_v7 }
  0x32 PF: > { %514 = sbr.rel (%p1781_p9) target bundleno = 1076 (0x434), region = 113  ;;  %s517_s3 = sand.u32 (!%p1781_p9), 1, %s1599_s29  }
  0x33   : > { %s1324_s22 = sshll.u32 (!%p1781_p9), %s517_s3, 5 }
  0x34   : > { %s1815_s25 = scalar_lea.vmem (!%p1781_p9), [#allocation5], %s1324_s22 }
  0x37   : > { %1590 = dma.done.wait (%p1794_p11), [#allocation8], 16  }
  0x38   : > { %1592 = vsyncadd (%p1794_p11), [#allocation8], 4294967280 }
  0x39   : > { %528 = sfence }
  0x3a   : > { %p564_p0 = scmp.lt.s32.totalorder %s1615_s17, 0  ;;  %s565_s13 = ssub.s32 0, %s1615_s17 }
  0x3b   : > { %s1326_s23 = smin.u32 %s1615_s17, %s565_s13  ;;  %p579_p1 = scmp.eq.s32.totalorder %s1615_s17, 0 }
  0x3c   : > { %s567_s29 = sand.u32 1, %s1326_s23   ;;  %p580_p2 = scmp.eq.s32.totalorder %s1611_s16, 0 }
  0x3d   : > { %s568_s27 = ssub.s32 0, %s567_s29  ;;  %p583_p4 = scmp.eq.s32.totalorder %s1607_s15, 0 }
  0x3e   : > { %s2266_s27 = smov (!%p564_p0, %s568_s27), %s567_s29  ;;  %p581_p3 = pnand %p580_p2, %p579_p1 }
  0x3f   : > { %p1328_p5 = scmp.lt.s32.totalorder %s2266_s27, 0  ;;  %s574_s24 = sadd.s32 2, %s2266_s27 }
  0x40   : > { %p582_p6 = pneg %p581_p3 }
  0x41   : > { %s2268_s24 = smov (!%p1328_p5, %s574_s24), %s2266_s27 }
  0x42   : > { %p584_p7 = pnand %p583_p4, %p582_p6  ;;  %s576_s20 = ssub.s32 1, %s2268_s24 }
  0x43   : > { %s1329_s26 = sshll.u32 %s2268_s24, 8  ;;  %s1831_s28 = sshll.u32 %s576_s20, 8 }
  0x44   : > { %587 = sbr.rel (%p584_p7) target bundleno = 107 (0x6b), region = 125 }
  0x49   : > { %v588_v8 = vld [vmem:[%s2203_s1] sm:$0xff]  ;;  %vm620_vm0 = vcmask 261120   ;;  %v589_v9 = vld [vmem:[%s2203_s1 + $0x8] sm:$0xff]  ;;  %v590_v10 = vld [vmem:[%s2203_s1 + $0x10] sm:$0xff]  ;;  %vm653_vm1 = vcmask 254976   ;;  %v1634_v40 = vmov 0.0  }
  0x4a   : > { %621 = vst.msk [vmem:[#allocation2] sm:$0xff] %vm620_vm0, %v588_v8  ;;  %v591_v11 = vld [vmem:[%s2203_s1 + $0x18] sm:$0xff]  ;;  %v592_v12 = vld [vmem:[%s2203_s1 + $0x20] sm:$0xff]  ;;  %v593_v13 = vld [vmem:[%s2203_s1 + $0x28] sm:$0xff] }
  0x4b   : > { %622 = vst.msk [vmem:[#allocation2 + $0x8] sm:$0xff] %vm620_vm0, %v589_v9  ;;  %v594_v14 = vld [vmem:[%s2203_s1 + $0x30] sm:$0xff]  ;;  %v595_v15 = vld [vmem:[%s2203_s1 + $0x38] sm:$0xff]  ;;  %v596_v16 = vld [vmem:[%s2203_s1 + $0x40] sm:$0xff] }
  0x4c   : > { %623 = vst.msk [vmem:[#allocation2 + $0x10] sm:$0xff] %vm620_vm0, %v590_v10  ;;  %v597_v17 = vld [vmem:[%s2203_s1 + $0x48] sm:$0xff]  ;;  %v598_v18 = vld [vmem:[%s2203_s1 + $0x50] sm:$0xff]  ;;  %v599_v19 = vld [vmem:[%s2203_s1 + $0x58] sm:$0xff] }
  0x4d   : > { %624 = vst.msk [vmem:[#allocation2 + $0x18] sm:$0xff] %vm620_vm0, %v591_v11  ;;  %v600_v20 = vld [vmem:[%s2203_s1 + $0x60] sm:$0xff]  ;;  %v601_v21 = vld [vmem:[%s2203_s1 + $0x68] sm:$0xff]  ;;  %v602_v22 = vld [vmem:[%s2203_s1 + $0x70] sm:$0xff] }
  0x4e   : > { %625 = vst.msk [vmem:[#allocation2 + $0x20] sm:$0xff] %vm620_vm0, %v592_v12  ;;  %v603_v23 = vld [vmem:[%s2203_s1 + $0x78] sm:$0xff]  ;;  %v604_v24 = vld [vmem:[%s2203_s1 + $0x80] sm:$0xff]  ;;  %v605_v25 = vld [vmem:[%s2203_s1 + $0x88] sm:$0xff] }
  0x4f   : > { %626 = vst.msk [vmem:[#allocation2 + $0x28] sm:$0xff] %vm620_vm0, %v593_v13  ;;  %v606_v26 = vld [vmem:[%s2203_s1 + $0x90] sm:$0xff]  ;;  %v607_v27 = vld [vmem:[%s2203_s1 + $0x98] sm:$0xff]  ;;  %v608_v28 = vld [vmem:[%s2203_s1 + $0xa0] sm:$0xff] }
  0x50   : > { %627 = vst.msk [vmem:[#allocation2 + $0x30] sm:$0xff] %vm620_vm0, %v594_v14  ;;  %v609_v29 = vld [vmem:[%s2203_s1 + $0xa8] sm:$0xff]  ;;  %v610_v30 = vld [vmem:[%s2203_s1 + $0xb0] sm:$0xff]  ;;  %v611_v31 = vld [vmem:[%s2203_s1 + $0xb8] sm:$0xff] }
  0x51   : > { %628 = vst.msk [vmem:[#allocation2 + $0x38] sm:$0xff] %vm620_vm0, %v595_v15  ;;  %v612_v32 = vld [vmem:[%s2203_s1 + $0xc0] sm:$0xff]  ;;  %v613_v33 = vld [vmem:[%s2203_s1 + $0xc8] sm:$0xff]  ;;  %v614_v34 = vld [vmem:[%s2203_s1 + $0xd0] sm:$0xff] }
  0x52   : > { %629 = vst.msk [vmem:[#allocation2 + $0x40] sm:$0xff] %vm620_vm0, %v596_v16  ;;  %v615_v35 = vld [vmem:[%s2203_s1 + $0xd8] sm:$0xff]  ;;  %v616_v36 = vld [vmem:[%s2203_s1 + $0xe0] sm:$0xff]  ;;  %v617_v37 = vld [vmem:[%s2203_s1 + $0xe8] sm:$0xff] }
  0x53   : > { %630 = vst.msk [vmem:[#allocation2 + $0x48] sm:$0xff] %vm620_vm0, %v597_v17  ;;  %v618_v38 = vld [vmem:[%s2203_s1 + $0xf0] sm:$0xff]  ;;  %v619_v39 = vld [vmem:[%s2203_s1 + $0xf8] sm:$0xff] }
  0x54   : > { %631 = vst.msk [vmem:[#allocation2 + $0x50] sm:$0xff] %vm620_vm0, %v598_v18 }
  0x55   : > { %632 = vst.msk [vmem:[#allocation2 + $0x58] sm:$0xff] %vm620_vm0, %v599_v19 }
  0x56   : > { %633 = vst.msk [vmem:[#allocation2 + $0x60] sm:$0xff] %vm620_vm0, %v600_v20 }
  0x57   : > { %634 = vst.msk [vmem:[#allocation2 + $0x68] sm:$0xff] %vm620_vm0, %v601_v21 }
  0x58   : > { %635 = vst.msk [vmem:[#allocation2 + $0x70] sm:$0xff] %vm620_vm0, %v602_v22 }
  0x59   : > { %636 = vst.msk [vmem:[#allocation2 + $0x78] sm:$0xff] %vm620_vm0, %v603_v23 }
  0x5a   : > { %637 = vst.msk [vmem:[#allocation2 + $0x80] sm:$0xff] %vm620_vm0, %v604_v24 }
  0x5b   : > { %638 = vst.msk [vmem:[#allocation2 + $0x88] sm:$0xff] %vm620_vm0, %v605_v25 }
  0x5c   : > { %639 = vst.msk [vmem:[#allocation2 + $0x90] sm:$0xff] %vm620_vm0, %v606_v26 }
  0x5d   : > { %640 = vst.msk [vmem:[#allocation2 + $0x98] sm:$0xff] %vm620_vm0, %v607_v27 }
  0x5e   : > { %641 = vst.msk [vmem:[#allocation2 + $0xa0] sm:$0xff] %vm620_vm0, %v608_v28 }
  0x5f   : > { %642 = vst.msk [vmem:[#allocation2 + $0xa8] sm:$0xff] %vm620_vm0, %v609_v29 }
  0x60   : > { %643 = vst.msk [vmem:[#allocation2 + $0xb0] sm:$0xff] %vm620_vm0, %v610_v30 }
  0x61   : > { %644 = vst.msk [vmem:[#allocation2 + $0xb8] sm:$0xff] %vm620_vm0, %v611_v31 }
  0x62   : > { %645 = vst.msk [vmem:[#allocation2 + $0xc0] sm:$0xff] %vm620_vm0, %v612_v32 }
  0x63   : > { %646 = vst.msk [vmem:[#allocation2 + $0xc8] sm:$0xff] %vm620_vm0, %v613_v33 }
  0x64   : > { %647 = vst.msk [vmem:[#allocation2 + $0xd0] sm:$0xff] %vm620_vm0, %v614_v34 }
  0x65   : > { %648 = vst.msk [vmem:[#allocation2 + $0xd8] sm:$0xff] %vm620_vm0, %v615_v35 }
  0x66   : > { %649 = vst.msk [vmem:[#allocation2 + $0xe0] sm:$0xff] %vm620_vm0, %v616_v36 }
  0x67   : > { %650 = vst.msk [vmem:[#allocation2 + $0xe8] sm:$0xff] %vm620_vm0, %v617_v37 }
  0x68   : > { %651 = vst.msk [vmem:[#allocation2 + $0xf0] sm:$0xff] %vm620_vm0, %v618_v38 }
  0x69   : > { %652 = vst.msk [vmem:[#allocation2 + $0xf8] sm:$0xff] %vm620_vm0, %v619_v39 }
  0x6a   : > { %654 = vst.msk [vmem:[#allocation4] sm:$0x3] %vm653_vm1, %v1634_v40 }
  0x6b PF: > { %p1331_p8 = scmp.ne.s32.totalorder %s1607_s15, 0 }
  0x6d   : > { %657 = sbr.rel (%p1331_p8) target bundleno = 123 (0x7b), region = 129 }
  0x72   : > { %vm658_vm2 = vcmask 261120   ;;  %v1635_v41 = vmov 0.0  }
  0x73   : > { %659 = vst.msk [vmem:[#allocation3] sm:$0xff] %vm658_vm2, %v1635_v41 }
  0x74   : > { %660 = vst.msk [vmem:[#allocation3 + $0x8] sm:$0xff] %vm658_vm2, %v1635_v41 }
  0x75   : > { %661 = vst.msk [vmem:[#allocation3 + $0x10] sm:$0xff] %vm658_vm2, %v1635_v41 }
  0x76   : > { %662 = vst.msk [vmem:[#allocation3 + $0x18] sm:$0xff] %vm658_vm2, %v1635_v41 }
  0x77   : > { %663 = vst.msk [vmem:[#allocation3 + $0x20] sm:$0xff] %vm658_vm2, %v1635_v41 }
  0x78   : > { %664 = vst.msk [vmem:[#allocation3 + $0x28] sm:$0xff] %vm658_vm2, %v1635_v41 }
  0x79   : > { %665 = vst.msk [vmem:[#allocation3 + $0x30] sm:$0xff] %vm658_vm2, %v1635_v41 }
  0x7a   : > { %666 = vst.msk [vmem:[#allocation3 + $0x38] sm:$0xff] %vm658_vm2, %v1635_v41 }
  0x7b PF: > { %s1332_s22 = sshll.u32 %s1607_s15, 7  ;;  %v1376_v2 = vld [vmem:[%s1815_s25] sm:$0xff]  ;;  %v1377_v3 = vld [vmem:[%s1815_s25 + $0x8] sm:$0xff]  ;;  %v1378_v4 = vld [vmem:[%s1815_s25 + $0x10] sm:$0xff]  ;;  %p780_p9 = scmp.eq.s32.totalorder %s1607_s15, 1  ;;  %vm771_vm3 = vcmask 261120  }
  0x7c   : > { %s668_s13 = sadd.s32 %s1332_s22, %s1329_s26  ;;  %v1379_v5 = vld [vmem:[%s1815_s25 + $0x18] sm:$0xff]  ;;  %v688_v7 = vld [vmem:[#allocation3 + $0x10] sm:$0xff]  ;;  %v687_v14 = vld [vmem:[#allocation3 + $0x8] sm:$0xff]  ;;  %p1349_p10 = scmp.ne.s32.totalorder %s1607_s15, 1 }
  0x7d   : > { %s1965_s23 = scalar_lea.vmem [#allocation2], %s668_s13  ;;  %v686_v6 = vld [vmem:[#allocation3] sm:$0xff]  ;;  %v689_v15 = vld [vmem:[#allocation3 + $0x18] sm:$0xff]  ;;  %s1998_s25 = sshll.u32 (!%p1349_p10), %s1615_s17, 5 }
  0x7e   : > { %v684_v42 = vld [vmem:[%s1965_s23 + $0x70] sm:$0xff]  ;;  %v685_v43 = vld [vmem:[%s1965_s23 + $0x78] sm:$0xff]  ;;  %v682_v44 = vld [vmem:[%s1965_s23 + $0x60] sm:$0xff]  ;;  %s2221_s29 = sshll.u32 (!%p1349_p10), %s1611_s16, 6  ;;  %s824_s11 = scalar_lea.vmem (!%p1349_p10), %s2206_s4, %s1998_s25 }
  0x7f   : > { %v709_v45 = vpack.c.bf16 %v685_v43, %v684_v42  ;;  %v683_v46 = vld [vmem:[%s1965_s23 + $0x68] sm:$0xff]  ;;  %v680_v48 = vld [vmem:[%s1965_s23 + $0x50] sm:$0xff]  ;;  %v681_v49 = vld [vmem:[%s1965_s23 + $0x58] sm:$0xff]  ;;  %s785_s12 = sadd.s32 (!%p1349_p10), %s2221_s29, %s1329_s26  ;;  %s804_s14 = sld [smem:[#allocation6 + %s1615_s17]] (!%p1349_p10) }
  0x80   : > { %v708_v47 = vpack.c.bf16 %v683_v46, %v682_v44  ;;  %v707_v50 = vpack.c.bf16 %v681_v49, %v680_v48  ;;  %v678_v51 = vld [vmem:[%s1965_s23 + $0x40] sm:$0xff]  ;;  %v679_v52 = vld [vmem:[%s1965_s23 + $0x48] sm:$0xff]  ;;  %v676_v54 = vld [vmem:[%s1965_s23 + $0x30] sm:$0xff]  ;;  %s2010_s3 = scalar_lea.vmem (!%p1349_p10), [#allocation2], %s785_s12  ;;  %s894_s13 = scalar_lea.vmem (!%p1349_p10), %s2207_s5, %s1615_s17 }
  0x81   : > { %734 = vmatpush.bf16.msra.mxu0 %v709_v45  ;;  %1380 = vmatpush.bf16.msra.mxu1 %v709_v45  ;;  %v706_v53 = vpack.c.bf16 %v679_v52, %v678_v51  ;;  %v677_v55 = vld [vmem:[%s1965_s23 + $0x38] sm:$0xff]  ;;  %v674_v57 = vld [vmem:[%s1965_s23 + $0x20] sm:$0xff]  ;;  %v675_v58 = vld [vmem:[%s1965_s23 + $0x28] sm:$0xff]  ;;  %s907_s20 = scalar_lea.vmem (!%p1349_p10), %s2208_s6, %s1615_s17  ;;  %s1011_s29 = scalar_lea.vmem (!%p1349_p10), %s2211_s9, %s1615_s17 }
  0x82   : > { %1381 = vmatpush.bf16.msra.mxu2 %v709_v45  ;;  %1382 = vmatpush.bf16.msra.mxu3 %v709_v45  ;;  %v705_v56 = vpack.c.bf16 %v677_v55, %v676_v54  ;;  %v704_v59 = vpack.c.bf16 %v675_v58, %v674_v57  ;;  %v672_v60 = vld [vmem:[%s1965_s23 + $0x10] sm:$0xff]  ;;  %v673_v61 = vld [vmem:[%s1965_s23 + $0x18] sm:$0xff]  ;;  %v670_v63 = vld [vmem:[%s1965_s23] sm:$0xff]  ;;  %s2237_s24 = sshll.u32 (!%p1349_p10), %s1611_s16, 6  ;;  %p1368_p11 = scmp.ne.s32.totalorder (!%p1349_p10), %s1611_s16, 3 }
  0x83   : > { %v703_v62 = vpack.c.bf16 %v673_v61, %v672_v60  ;;  %v671_v0 = vld [vmem:[%s1965_s23 + $0x8] sm:$0xff]  ;;  %v692_v13 = vld [vmem:[#allocation3 + $0x30] sm:$0xff]  ;;  %v691_v24 = vld [vmem:[#allocation3 + $0x28] sm:$0xff]  ;;  %s786_s26 = sadd.s32 (!%p1349_p10), %s2237_s24, %s1831_s28 }
  0x84   : > { %v702_v1 = vpack.c.bf16 %v671_v0, %v670_v63  ;;  %v690_v12 = vld [vmem:[#allocation3 + $0x20] sm:$0xff]  ;;  %v693_v25 = vld [vmem:[#allocation3 + $0x38] sm:$0xff]  ;;  %s2079_s23 = scalar_lea.vmem (!%p1349_p10), [#allocation2], %s786_s26 }
  0x85   : > { %735 = vmatpush.bf16.msra.mxu0 %v708_v47  ;;  %1383 = vmatpush.bf16.msra.mxu1 %v708_v47  ;;  %s805_s22 = sadd.f32 (!%p1349_p10), 1.0, %s804_s14  ;;  %s928_s14 = scalar_lea.vmem (!%p1349_p10), %s2209_s7, %s1998_s25 }
  0x86   : > { %1384 = vmatpush.bf16.msra.mxu2 %v708_v47  ;;  %1385 = vmatpush.bf16.msra.mxu3 %v708_v47 }
  0x89   : > { %736 = vmatpush.bf16.msra.mxu0 %v707_v50  ;;  %1386 = vmatpush.bf16.msra.mxu1 %v707_v50 }
  0x8a   : > { %1387 = vmatpush.bf16.msra.mxu2 %v707_v50  ;;  %1388 = vmatpush.bf16.msra.mxu3 %v707_v50 }
  0x8d   : > { %737 = vmatpush.bf16.msra.mxu0 %v706_v53  ;;  %1389 = vmatpush.bf16.msra.mxu1 %v706_v53 }
  0x8e   : > { %1390 = vmatpush.bf16.msra.mxu2 %v706_v53  ;;  %1391 = vmatpush.bf16.msra.mxu3 %v706_v53 }
  0x91   : > { %738 = vmatpush.bf16.msra.mxu0 %v705_v56  ;;  %1392 = vmatpush.bf16.msra.mxu1 %v705_v56 }
  0x92   : > { %1393 = vmatpush.bf16.msra.mxu2 %v705_v56  ;;  %1394 = vmatpush.bf16.msra.mxu3 %v705_v56 }
  0x95   : > { %739 = vmatpush.bf16.msra.mxu0 %v704_v59  ;;  %1395 = vmatpush.bf16.msra.mxu1 %v704_v59 }
  0x96   : > { %1396 = vmatpush.bf16.msra.mxu2 %v704_v59  ;;  %1397 = vmatpush.bf16.msra.mxu3 %v704_v59 }
  0x99   : > { %740 = vmatpush.bf16.msra.mxu0 %v703_v62  ;;  %1398 = vmatpush.bf16.msra.mxu1 %v703_v62 }
  0x9a   : > { %1399 = vmatpush.bf16.msra.mxu2 %v703_v62  ;;  %1400 = vmatpush.bf16.msra.mxu3 %v703_v62 }
  0x9d   : > { %741 = vmatpush.bf16.msra.mxu0 %v702_v1  ;;  %1401 = vmatpush.bf16.msra.mxu1 %v702_v1 }
  0x9e   : > { %1402 = vmatpush.bf16.msra.mxu2 %v702_v1  ;;  %1403 = vmatpush.bf16.msra.mxu3 %v702_v1 }
  0xa0   : > { %742 = vmatmul.bf16.vlgmr.msra.gmra.mxu0 %v1376_v2  ;;  %747 = vmatmul.bf16.vlgmr.msra.gmra.mxu1 %v1377_v3 }
  0xa1   : > { %752 = vmatmul.bf16.vlgmr.msra.gmra.mxu2 %v1378_v4  ;;  %757 = vmatmul.bf16.vlgmr.msra.gmra.mxu3 %v1379_v5 }
 0x11d   : > { %v743_v8 = vpop.f32.mrf.mxu0  ;;  %v748_v9 = vpop.f32.mrf.mxu1 }
 0x11e   : > { %v763_v10 = vadd.f32 %v743_v8, %v686_v6  ;;  %v765_v11 = vadd.f32 %v748_v9, %v688_v7 }
 0x120   : > { %772 = vst.msk [vmem:[#allocation3] sm:$0xff] %vm771_vm3, %v763_v10 }
 0x121   : > { %774 = vst.msk [vmem:[#allocation3 + $0x10] sm:$0xff] %vm771_vm3, %v765_v11 }
 0x124   : > { %v753_v16 = vpop.f32.mrf.mxu2  ;;  %v758_v17 = vpop.f32.mrf.mxu3 }
 0x125   : > { %v767_v18 = vadd.f32 %v753_v16, %v690_v12  ;;  %v769_v19 = vadd.f32 %v758_v17, %v692_v13  ;;  %v745_v20 = vpop.f32.mrf.mxu0  ;;  %v750_v21 = vpop.f32.mrf.mxu1 }
 0x126   : > { %v764_v22 = vadd.f32 %v745_v20, %v687_v14  ;;  %v766_v23 = vadd.f32 %v750_v21, %v689_v15 }
 0x127   : > { %776 = vst.msk [vmem:[#allocation3 + $0x20] sm:$0xff] %vm771_vm3, %v767_v18 }
 0x128   : > { %778 = vst.msk [vmem:[#allocation3 + $0x30] sm:$0xff] %vm771_vm3, %v769_v19 }
 0x129   : > { %773 = vst.msk [vmem:[#allocation3 + $0x8] sm:$0xff] %vm771_vm3, %v764_v22 }
 0x12a   : > { %775 = vst.msk [vmem:[#allocation3 + $0x18] sm:$0xff] %vm771_vm3, %v766_v23 }
 0x12c   : > { %v755_v26 = vpop.f32.mrf.mxu2  ;;  %v760_v27 = vpop.f32.mrf.mxu3  ;;  %783 = sbr.rel (%p1349_p10) target bundleno = 916 (0x394), region = 133 }
 0x12d   : > { %v768_v28 = vadd.f32 %v755_v26, %v691_v24  ;;  %v770_v29 = vadd.f32 %v760_v27, %v693_v25 }
 0x12f   : > { %777 = vst.msk [vmem:[#allocation3 + $0x28] sm:$0xff] %vm771_vm3, %v768_v28 }
 0x130   : > { %779 = vst.msk [vmem:[#allocation3 + $0x38] sm:$0xff] %vm771_vm3, %v770_v29 }
 0x131   : > { %v828_v30 = vld [vmem:[%s824_s11 + $0x18] sm:$0xff]  ;;  %v827_v31 = vld [vmem:[%s824_s11 + $0x10] sm:$0xff]  ;;  %v826_v32 = vld [vmem:[%s824_s11 + $0x8] sm:$0xff]  ;;  %v806_v37 = vstv %s805_s22 }
 0x132   : > { %1404 = vmatpush.msra.mxu2 %v828_v30  ;;  %865 = vmatpush.msra.mxu0 %v828_v30  ;;  %v825_v33 = vld [vmem:[%s824_s11] sm:$0xff]  ;;  %v800_v36 = vld [vmem:[#allocation3 + $0x20] sm:$0xff]  ;;  %v797_v48 = vld [vmem:[#allocation3 + $0x8] sm:$0xff]  ;;  %s998_s11 = scalar_lea.vmem %s2210_s8, %s1615_s17 }
 0x133   : > { %v792_v34 = vld [vmem:[%s2010_s3 + $0x20] sm:$0xff]  ;;  %v796_v38 = vld [vmem:[#allocation3] sm:$0xff]  ;;  %v794_v51 = vld [vmem:[%s2010_s3 + $0x30] sm:$0xff] }
 0x134   : > { %1405 = vmatpush.msra.mxu2 %v827_v31  ;;  %866 = vmatpush.msra.mxu0 %v827_v31  ;;  %v788_v35 = vld [vmem:[%s2010_s3] sm:$0xff]  ;;  %v811_v39 = vmul.f32 %v806_v37, %v792_v34  ;;  %v793_v41 = vld [vmem:[%s2010_s3 + $0x28] sm:$0xff]  ;;  %v790_v52 = vld [vmem:[%s2010_s3 + $0x10] sm:$0xff]  ;;  %v813_v53 = vmul.f32 %v806_v37, %v794_v51 }
 0x135   : > { %v807_v40 = vmul.f32 %v806_v37, %v788_v35  ;;  %v789_v42 = vld [vmem:[%s2010_s3 + $0x8] sm:$0xff]  ;;  %v812_v45 = vmul.f32 %v806_v37, %v793_v41  ;;  %v809_v54 = vmul.f32 %v806_v37, %v790_v52  ;;  %v802_v55 = vld [vmem:[#allocation3 + $0x30] sm:$0xff]  ;;  %v799_v0 = vld [vmem:[#allocation3 + $0x18] sm:$0xff] }
 0x136   : > { %1406 = vmatpush.msra.mxu2 %v826_v32  ;;  %867 = vmatpush.msra.mxu0 %v826_v32  ;;  %v819_v43 = vadd.f32 %v811_v39, %v800_v36  ;;  %v808_v46 = vmul.f32 %v806_v37, %v789_v42  ;;  %v801_v47 = vld [vmem:[#allocation3 + $0x28] sm:$0xff]  ;;  %v798_v56 = vld [vmem:[#allocation3 + $0x10] sm:$0xff]  ;;  %v821_v57 = vadd.f32 %v813_v53, %v802_v55  ;;  %v930_v5 = vld [vmem:[%s928_s14 + $0x8] sm:$0xff] }
 0x137   : > { %v815_v44 = vadd.f32 %v807_v40, %v796_v38  ;;  %v820_v49 = vadd.f32 %v812_v45, %v801_v47  ;;  %v817_v58 = vadd.f32 %v809_v54, %v798_v56  ;;  %v795_v59 = vld [vmem:[%s2010_s3 + $0x38] sm:$0xff]  ;;  %v803_v63 = vld [vmem:[#allocation3 + $0x38] sm:$0xff]  ;;  %v931_v4 = vld [vmem:[%s928_s14 + $0x10] sm:$0xff] }
 0x138   : > { %1407 = vmatpush.msra.mxu2 %v825_v33  ;;  %868 = vmatpush.msra.mxu0 %v825_v33  ;;  %v816_v50 = vadd.f32 %v808_v46, %v797_v48  ;;  %v791_v60 = vld [vmem:[%s2010_s3 + $0x18] sm:$0xff]  ;;  %v814_v61 = vmul.f32 %v806_v37, %v795_v59  ;;  %v929_v6 = vld [vmem:[%s928_s14] sm:$0xff] }
 0x139   : > { %1356 = vmatmul.msk.f32.vlgmr.msra.gmra.mxu2 %vm771_vm3, %v819_v43  ;;  %1352 = vmatmul.msk.f32.vlgmr.msra.gmra.mxu0 %vm771_vm3, %v815_v44  ;;  %v810_v62 = vmul.f32 %v806_v37, %v791_v60  ;;  %v932_v3 = vld [vmem:[%s928_s14 + $0x18] sm:$0xff]  ;;  %v1504_v7 = vld [vmem:[%s894_s13] ss:$0 sm:$0xff]  ;;  %s2120_s14 = scalar_lea.vmem (!%p1368_p11), %s2212_s10, %s1998_s25 }
 0x13a   : > { %v822_v1 = vadd.f32 %v814_v61, %v803_v63  ;;  %1408 = vmatpush.msra.mxu3 %v932_v3  ;;  %969 = vmatpush.msra.mxu1 %v932_v3  ;;  %v1505_v10 = vld [vmem:[%s907_s20] ss:$0 sm:$0xff] }
 0x13b   : > { %v818_v2 = vadd.f32 %v810_v62, %v799_v0  ;;  %v1506_v41 = vld [vmem:[%s998_s11] ss:$0 sm:$0xff]  ;;  %s2102_s11 = scalar_lea.vmem (!%p1368_p11), [#allocation2], %s1831_s28 }
 0x13c   : > { %1409 = vmatpush.msra.mxu3 %v931_v4  ;;  %970 = vmatpush.msra.mxu1 %v931_v4  ;;  %v1507_v42 = vld [vmem:[%s1011_s29] ss:$0 sm:$0xff] }
 0x13e   : > { %1410 = vmatpush.msra.mxu3 %v930_v5  ;;  %971 = vmatpush.msra.mxu1 %v930_v5 }
 0x140   : > { %1411 = vmatpush.msra.mxu3 %v929_v6  ;;  %972 = vmatpush.msra.mxu1 %v929_v6 }
 0x141   : > { %1357 = vmatmul.msk.f32.gmra.mxu2 %vm771_vm3, %v820_v49  ;;  %1353 = vmatmul.msk.f32.gmra.mxu0 %vm771_vm3, %v816_v50 }
 0x149   : > { %1358 = vmatmul.msk.f32.gmra.mxu2 %vm771_vm3, %v821_v57  ;;  %1354 = vmatmul.msk.f32.gmra.mxu0 %vm771_vm3, %v817_v58 }
 0x151   : > { %1359 = vmatmul.msk.f32.gmra.mxu2 %vm771_vm3, %v822_v1  ;;  %1355 = vmatmul.msk.f32.gmra.mxu0 %vm771_vm3, %v818_v2 }
 0x1b6   : > { %v870_v8 = vpop.f32.mrf.mxu0 }
 0x1b7   : > { %v899_v9 = vmul.f32 %v1504_v7, %v870_v8 }
 0x1b9   : > { %v912_v11 = vadd.f32 %v1505_v10, %v899_v9 }
 0x1bb   : > { %v920_v12 = vmax.f32 %v912_v11, 0.0 }
 0x1bc   : > { %v882_v13 = vpop.f32.mrf.mxu2 }
 0x1bd   : > { %v903_v14 = vmul.f32 %v1504_v7, %v882_v13  ;;  %1360 = vmatmul.msk.f32.vlgmr.msra.gmra.mxu1 %vm771_vm3, %v920_v12 }
 0x1be   : > { %v873_v15 = vpop.f32.mrf.mxu0 }
 0x1bf   : > { %v916_v16 = vadd.f32 %v1505_v10, %v903_v14  ;;  %v900_v17 = vmul.f32 %v1504_v7, %v873_v15 }
 0x1c1   : > { %v924_v18 = vmax.f32 %v916_v16, 0.0  ;;  %v913_v19 = vadd.f32 %v1505_v10, %v900_v17 }
 0x1c3   : > { %1364 = vmatmul.msk.f32.vlgmr.msra.gmra.mxu3 %vm771_vm3, %v924_v18  ;;  %v921_v20 = vmax.f32 %v913_v19, 0.0 }
 0x1c4   : > { %v885_v21 = vpop.f32.mrf.mxu2 }
 0x1c5   : > { %v904_v22 = vmul.f32 %v1504_v7, %v885_v21  ;;  %1361 = vmatmul.msk.f32.gmra.mxu1 %vm771_vm3, %v921_v20 }
 0x1c6   : > { %v876_v23 = vpop.f32.mrf.mxu0 }
 0x1c7   : > { %v917_v24 = vadd.f32 %v1505_v10, %v904_v22  ;;  %v901_v25 = vmul.f32 %v1504_v7, %v876_v23 }
 0x1c9   : > { %v925_v26 = vmax.f32 %v917_v24, 0.0  ;;  %v914_v27 = vadd.f32 %v1505_v10, %v901_v25 }
 0x1cb   : > { %1365 = vmatmul.msk.f32.gmra.mxu3 %vm771_vm3, %v925_v26  ;;  %v922_v28 = vmax.f32 %v914_v27, 0.0 }
 0x1cc   : > { %v888_v29 = vpop.f32.mrf.mxu2 }
 0x1cd   : > { %v905_v30 = vmul.f32 %v1504_v7, %v888_v29  ;;  %1362 = vmatmul.msk.f32.gmra.mxu1 %vm771_vm3, %v922_v28 }
 0x1ce   : > { %v879_v31 = vpop.f32.mrf.mxu0 }
 0x1cf   : > { %v918_v32 = vadd.f32 %v1505_v10, %v905_v30  ;;  %v902_v33 = vmul.f32 %v1504_v7, %v879_v31 }
 0x1d1   : > { %v926_v34 = vmax.f32 %v918_v32, 0.0  ;;  %v915_v35 = vadd.f32 %v1505_v10, %v902_v33 }
 0x1d3   : > { %1366 = vmatmul.msk.f32.gmra.mxu3 %vm771_vm3, %v926_v34  ;;  %v923_v36 = vmax.f32 %v915_v35, 0.0 }
 0x1d4   : > { %v891_v37 = vpop.f32.mrf.mxu2 }
 0x1d5   : > { %v906_v38 = vmul.f32 %v1504_v7, %v891_v37  ;;  %1363 = vmatmul.msk.f32.gmra.mxu1 %vm771_vm3, %v923_v36 }
 0x1d7   : > { %v919_v39 = vadd.f32 %v1505_v10, %v906_v38 }
 0x1d9   : > { %v927_v40 = vmax.f32 %v919_v39, 0.0 }
 0x1db   : > { %1367 = vmatmul.msk.f32.gmra.mxu3 %vm771_vm3, %v927_v40 }
 0x23a   : > { %v974_v43 = vpop.f32.mrf.mxu1 }
 0x23b   : > { %v1003_v44 = vmul.f32 %v1506_v41, %v974_v43 }
 0x23d   : > { %v1016_v45 = vadd.f32 %v1507_v42, %v1003_v44 }
 0x23f   : > { %v1024_v46 = vmax.f32 %v1016_v45, 0.0 }
 0x241   : > { %1033 = vst.msk [vmem:[%s2079_s23] sm:$0xff] %vm771_vm3, %v1024_v46 }
 0x242   : > { %v977_v47 = vpop.f32.mrf.mxu1 }
 0x243   : > { %v1004_v48 = vmul.f32 %v1506_v41, %v977_v47 }
 0x245   : > { %v1017_v49 = vadd.f32 %v1507_v42, %v1004_v48 }
 0x246   : > { %v986_v50 = vpop.f32.mrf.mxu3 }
 0x247   : > { %v1007_v51 = vmul.f32 %v1506_v41, %v986_v50  ;;  %v1025_v52 = vmax.f32 %v1017_v49, 0.0 }
 0x249   : > { %v1020_v53 = vadd.f32 %v1507_v42, %v1007_v51  ;;  %1034 = vst.msk [vmem:[%s2079_s23 + $0x8] sm:$0xff] %vm771_vm3, %v1025_v52 }
 0x24a   : > { %v980_v54 = vpop.f32.mrf.mxu1 }
 0x24b   : > { %v1028_v55 = vmax.f32 %v1020_v53, 0.0  ;;  %v1005_v56 = vmul.f32 %v1506_v41, %v980_v54 }
 0x24d   : > { %1037 = vst.msk [vmem:[%s2079_s23 + $0x20] sm:$0xff] %vm771_vm3, %v1028_v55  ;;  %v1018_v57 = vadd.f32 %v1507_v42, %v1005_v56 }
 0x24e   : > { %v989_v58 = vpop.f32.mrf.mxu3 }
 0x24f   : > { %v1008_v59 = vmul.f32 %v1506_v41, %v989_v58  ;;  %v1026_v60 = vmax.f32 %v1018_v57, 0.0 }
 0x251   : > { %v1021_v61 = vadd.f32 %v1507_v42, %v1008_v59  ;;  %1035 = vst.msk [vmem:[%s2079_s23 + $0x10] sm:$0xff] %vm771_vm3, %v1026_v60 }
 0x252   : > { %v983_v62 = vpop.f32.mrf.mxu1 }
 0x253   : > { %v1029_v63 = vmax.f32 %v1021_v61, 0.0  ;;  %v1006_v0 = vmul.f32 %v1506_v41, %v983_v62 }
 0x255   : > { %1038 = vst.msk [vmem:[%s2079_s23 + $0x28] sm:$0xff] %vm771_vm3, %v1029_v63  ;;  %v1019_v1 = vadd.f32 %v1507_v42, %v1006_v0 }
 0x256   : > { %v992_v2 = vpop.f32.mrf.mxu3 }
 0x257   : > { %v1009_v3 = vmul.f32 %v1506_v41, %v992_v2  ;;  %v1027_v4 = vmax.f32 %v1019_v1, 0.0 }
 0x259   : > { %v1022_v5 = vadd.f32 %v1507_v42, %v1009_v3  ;;  %1036 = vst.msk [vmem:[%s2079_s23 + $0x18] sm:$0xff] %vm771_vm3, %v1027_v4 }
 0x25b   : > { %v1030_v6 = vmax.f32 %v1022_v5, 0.0 }
 0x25d   : > { %1039 = vst.msk [vmem:[%s2079_s23 + $0x30] sm:$0xff] %vm771_vm3, %v1030_v6 }
 0x25e   : > { %v995_v7 = vpop.f32.mrf.mxu3 }
 0x25f   : > { %v1010_v8 = vmul.f32 %v1506_v41, %v995_v7 }
 0x261   : > { %v1023_v9 = vadd.f32 %v1507_v42, %v1010_v8  ;;  %1044 = sbr.rel (%p1368_p11) target bundleno = 916 (0x394), region = 137 }
 0x263   : > { %v1031_v10 = vmax.f32 %v1023_v9, 0.0 }
 0x265   : > { %1040 = vst.msk [vmem:[%s2079_s23 + $0x38] sm:$0xff] %vm771_vm3, %v1031_v10 }
 0x266   : > { %v1078_v11 = vld [vmem:[%s2204_s2] sm:$0xf]  ;;  %v1130_v26 = vld [vmem:[%s2120_s14 + $0x18] sm:$0xff]  ;;  %v1129_v27 = vld [vmem:[%s2120_s14 + $0x10] sm:$0xff]  ;;  %vm1155_vm4 = vcmask 254976  }
 0x267   : > { %1080 = vst [vmem:[#allocation1] ss:$4 sm:$0xff] %v1078_v11  ;;  %1146 = vmatpush.msra.mxu2 %v1130_v26  ;;  %v1128_v48 = vld [vmem:[%s2120_s14 + $0x8] sm:$0xff]  ;;  %v1127_v49 = vld [vmem:[%s2120_s14] sm:$0xff] }
 0x268   : > { %v1125_v53 = vld [vmem:[#allocation4] sm:$0x3] }
 0x269   : > { %1147 = vmatpush.msra.mxu2 %v1129_v27 }
 0x26b   : > { %1148 = vmatpush.msra.mxu2 %v1128_v48 }
 0x26c   : > { %v1061_v12 = vld [vmem:[%s2102_s11 + $0x78] sm:$0xff]  ;;  %v1060_v14 = vld [vmem:[%s2102_s11 + $0x70] sm:$0xff]  ;;  %v1059_v16 = vld [vmem:[%s2102_s11 + $0x68] sm:$0xff] }
 0x26d   : > { %v1077_v13 = vld [vmem:[%s2102_s11 + $0xf8] sm:$0xff]  ;;  %1085 = vmatpush.msra.mxu0 %v1061_v12  ;;  %v1076_v15 = vld [vmem:[%s2102_s11 + $0xf0] sm:$0xff]  ;;  %v1075_v17 = vld [vmem:[%s2102_s11 + $0xe8] sm:$0xff]  ;;  %1149 = vmatpush.msra.mxu2 %v1127_v49 }
 0x26e   : > { %1105 = vmatpush.msra.mxu1 %v1077_v13  ;;  %v1058_v18 = vld [vmem:[%s2102_s11 + $0x60] sm:$0xff]  ;;  %v1057_v20 = vld [vmem:[%s2102_s11 + $0x58] sm:$0xff]  ;;  %v1056_v22 = vld [vmem:[%s2102_s11 + $0x50] sm:$0xff] }
 0x26f   : > { %1086 = vmatpush.msra.mxu0 %v1060_v14  ;;  %v1074_v19 = vld [vmem:[%s2102_s11 + $0xe0] sm:$0xff]  ;;  %v1073_v21 = vld [vmem:[%s2102_s11 + $0xd8] sm:$0xff]  ;;  %v1072_v23 = vld [vmem:[%s2102_s11 + $0xd0] sm:$0xff] }
 0x270   : > { %1106 = vmatpush.msra.mxu1 %v1076_v15  ;;  %v1055_v24 = vld [vmem:[%s2102_s11 + $0x48] sm:$0xff]  ;;  %v1054_v28 = vld [vmem:[%s2102_s11 + $0x40] sm:$0xff]  ;;  %v1053_v30 = vld [vmem:[%s2102_s11 + $0x38] sm:$0xff] }
 0x271   : > { %1087 = vmatpush.msra.mxu0 %v1059_v16  ;;  %v1071_v25 = vld [vmem:[%s2102_s11 + $0xc8] sm:$0xff]  ;;  %v1070_v29 = vld [vmem:[%s2102_s11 + $0xc0] sm:$0xff]  ;;  %v1069_v31 = vld [vmem:[%s2102_s11 + $0xb8] sm:$0xff] }
 0x272   : > { %1107 = vmatpush.msra.mxu1 %v1075_v17  ;;  %v1052_v32 = vld [vmem:[%s2102_s11 + $0x30] sm:$0xff]  ;;  %v1051_v34 = vld [vmem:[%s2102_s11 + $0x28] sm:$0xff]  ;;  %v1050_v36 = vld [vmem:[%s2102_s11 + $0x20] sm:$0xff] }
 0x273   : > { %1088 = vmatpush.msra.mxu0 %v1058_v18  ;;  %v1068_v33 = vld [vmem:[%s2102_s11 + $0xb0] sm:$0xff]  ;;  %v1067_v35 = vld [vmem:[%s2102_s11 + $0xa8] sm:$0xff]  ;;  %v1066_v37 = vld [vmem:[%s2102_s11 + $0xa0] sm:$0xff] }
 0x274   : > { %1108 = vmatpush.msra.mxu1 %v1074_v19  ;;  %v1049_v38 = vld [vmem:[%s2102_s11 + $0x18] sm:$0xff]  ;;  %v1048_v40 = vld [vmem:[%s2102_s11 + $0x10] sm:$0xff]  ;;  %v1047_v42 = vld [vmem:[%s2102_s11 + $0x8] sm:$0xff] }
 0x275   : > { %1089 = vmatpush.msra.mxu0 %v1057_v20  ;;  %v1065_v39 = vld [vmem:[%s2102_s11 + $0x98] sm:$0xff]  ;;  %v1064_v41 = vld [vmem:[%s2102_s11 + $0x90] sm:$0xff]  ;;  %v1063_v43 = vld [vmem:[%s2102_s11 + $0x88] sm:$0xff] }
 0x276   : > { %1109 = vmatpush.msra.mxu1 %v1073_v21  ;;  %v1046_v44 = vld [vmem:[%s2102_s11] sm:$0xff]  ;;  %v1082_v47 = vld.sshfl [vmem:[#allocation1 + $0x8] sm:$0xff pattern:$0x73625140] }
 0x277   : > { %1090 = vmatpush.msra.mxu0 %v1056_v22  ;;  %v1062_v45 = vld [vmem:[%s2102_s11 + $0x80] sm:$0xff] }
 0x278   : > { %1110 = vmatpush.msra.mxu1 %v1072_v23  ;;  %v1081_v46 = vld.sshfl [vmem:[#allocation1] sm:$0xff pattern:$0x73625140] }
 0x279   : > { %1091 = vmatpush.msra.mxu0 %v1055_v24 }
 0x27a   : > { %1111 = vmatpush.msra.mxu1 %v1071_v25 }
 0x27b   : > { %1092 = vmatpush.msra.mxu0 %v1054_v28 }
 0x27c   : > { %1112 = vmatpush.msra.mxu1 %v1070_v29 }
 0x27d   : > { %1093 = vmatpush.msra.mxu0 %v1053_v30 }
 0x27e   : > { %1113 = vmatpush.msra.mxu1 %v1069_v31 }
 0x27f   : > { %1094 = vmatpush.msra.mxu0 %v1052_v32 }
 0x280   : > { %1114 = vmatpush.msra.mxu1 %v1068_v33 }
 0x281   : > { %1095 = vmatpush.msra.mxu0 %v1051_v34 }
 0x282   : > { %1115 = vmatpush.msra.mxu1 %v1067_v35 }
 0x283   : > { %1096 = vmatpush.msra.mxu0 %v1050_v36 }
 0x284   : > { %1116 = vmatpush.msra.mxu1 %v1066_v37 }
 0x285   : > { %1097 = vmatpush.msra.mxu0 %v1049_v38 }
 0x286   : > { %1117 = vmatpush.msra.mxu1 %v1065_v39 }
 0x287   : > { %1098 = vmatpush.msra.mxu0 %v1048_v40 }
 0x288   : > { %1118 = vmatpush.msra.mxu1 %v1064_v41 }
 0x289   : > { %1099 = vmatpush.msra.mxu0 %v1047_v42 }
 0x28a   : > { %1119 = vmatpush.msra.mxu1 %v1063_v43 }
 0x28b   : > { %1100 = vmatpush.msra.mxu0 %v1046_v44 }
 0x28c   : > { %1120 = vmatpush.msra.mxu1 %v1062_v45  ;;  %1101 = vmatmul.f32.vlgmr.msra.gmra.mxu0 %v1081_v46 }
 0x28d   : > { %1121 = vmatmul.f32.vlgmr.msra.gmra.mxu1 %v1082_v47 }
 0x309   : > { %v1102_v50 = vpop.f32.mrf.mxu0 }
 0x30a   : > { %v1122_v51 = vpop.f32.mrf.mxu1 }
 0x30b   : > { %v1123_v52 = vadd.f32 %v1122_v51, %v1102_v50 }
 0x30d   : > { %1369 = vmatmul.msk.f32.vlgmr.msra.gmra.mxu2 %vm771_vm3, %v1123_v52 }
 0x390   : > { %v1151_v54 = vpop.f32.mrf.mxu2 }
 0x391   : > { %v1154_v55 = vadd.f32 %v1151_v54, %v1125_v53 }
 0x393   : > { %1156 = vst.msk [vmem:[#allocation4] sm:$0x3] %vm1155_vm4, %v1154_v55 }
 0x394 PF: > { %p1157_p12 = scmp.eq.s32.totalorder %s1615_s17, 2  ;;  %p1158_p13 = scmp.eq.s32.totalorder %s1611_s16, 3 }
 0x396   : > { %p1159_p0 = pnand %p1158_p13, %p1157_p12 }
 0x398   : > { %p1160_p1 = pneg %p1159_p0 }
 0x39a   : > { %p1161_p2 = pnand %p1160_p1, %p780_p9 }
 0x39b   : > { %s2238_s20 = sld [smem:[#allocation19_spill]] (!%p1161_p2) }
 0x39c   : > { %1164 = sbr.rel (%p1161_p2) target bundleno = 1066 (0x42a), region = 141  ;;  %s2240_s29 = sld [smem:[#allocation18_spill]] (!%p1161_p2) }
 0x39d   : > { %s2241_s12 = sld [smem:[#allocation20_spill]] (!%p1161_p2) }
 0x3a1   : > { %s2239_s3 = smov %s2238_s20  ;;  %v1175_v56 = vld [vmem:[%s2238_s20 + $0x18] sm:$0xff]  ;;  %v1165_v58 = vld [vmem:[#allocation4] sm:$0x3]  ;;  %vm1203_vm5 = vcmask 58368  }
 0x3a2   : > { %v1174_v57 = vld [vmem:[%s2239_s3 + $0x10] sm:$0xff]  ;;  %1195 = vmatpush.msra.mxu0 %v1175_v56  ;;  %v1173_v59 = vld [vmem:[%s2239_s3 + $0x8] sm:$0xff]  ;;  %v1508_v60 = vld [vmem:[%s2240_s29] ss:$0 sm:$0xff] }
 0x3a3   : > { %v1172_v61 = vld [vmem:[%s2239_s3] sm:$0xff]  ;;  %v1170_v62 = vadd.f32 %v1508_v60, %v1165_v58 }
 0x3a4   : > { %1196 = vmatpush.msra.mxu0 %v1174_v57  ;;  %v1509_v0 = vld [vmem:[%s2241_s12] ss:$0 sm:$0xff] }
 0x3a5   : > { %v1171_v63 = vmax.f32 %v1170_v62, 0.0 }
 0x3a6   : > { %1197 = vmatpush.msra.mxu0 %v1173_v59 }
 0x3a8   : > { %1198 = vmatpush.msra.mxu0 %v1172_v61 }
 0x3a9   : > { %1370 = vmatmul.msk.f32.vlgmr.msra.gmra.mxu0 %vm771_vm3, %v1171_v63 }
 0x426   : > { %v1200_v1 = vpop.f32.mrf.mxu0 }
 0x427   : > { %v1201_v2 = vadd.f32 %v1509_v0, %v1200_v1 }
 0x429   : > { %1204 = vst.msk [vmem:[#allocation9] sm:$0x3] %vm1203_vm5, %v1201_v2 }
 0x42a PF: > { %s2242_s14 = sadd.s32 4294967295, %s1631_s21   ;;  %s2243_s20 = sld [smem:[#allocation21_spill]] }
 0x42b   : > { %p1426_p3 = scmp.eq.s32.totalorder %s2242_s14, 23  ;;  %s1636_s24 = smov [#allocation9]  }
 0x42c   : > { %s1211_s26 = sshll.u32 %s1636_s24, 4  ;;  %s1212_s26 = int_to_ptr.vmem [resolvable:$true] %s1211_s26 }
 0x430   : > { %s1213_s22 = sshll.u32 %s2243_s20, 4  ;;  %s1214_s22 = int_to_ptr.hbm [resolvable:$true] %s1213_s22 }
 0x431   : > { %1417 = dma.vmem_to_hbm [thread:$0]  (%p1426_p3), %s1212_s26, 32, %s1214_s22, [#allocation7]  }
 0x432   : > { %1594 = dma.done.wait (%p1426_p3), [#allocation7], 32  }
 0x433   : > { %1596 = vsyncadd (%p1426_p3), [#allocation7], 4294967264 }
 0x434 PF: > { %s26_s21 = sadd.s32 1, %s1631_s21   ;;  %s2244_s23 = sld [smem:[#allocation16_spill]] }
 0x435   : > { %p23_p4 = scmp.ge.s32.totalorder %s26_s21, 26   ;;  %s2245_s17 = sld [smem:[#allocation12_spill]] }
 0x436   : > { %s2246_s27 = sld [smem:[#allocation13_spill]]  ;;  %s2249_s29 = smov %s1603_s30 }
 0x437   : > { %s2247_s11 = sld [smem:[#allocation14_spill]]  ;;  %s2251_s15 = smov %s1619_s18 }
 0x438   : > { %s2248_s20 = sld [smem:[#allocation15_spill]]  ;;  %s2252_s16 = smov %s1623_s19 }
 0x439   :  { %25 = sbr.rel (!%p23_p4) target bundleno = 12 (0xc), region = 185 }
 0x43a   : > { %s2250_s30 = smov %s2244_s23 }
 0x43c   : > { %s2253_s18 = smov %s2246_s27 }
 0x43d   : > { %s2254_s19 = smov %s2247_s11 }
 0x43e   :  { %1227 = vsyncpa [#allocation7], 1 }
 0x43f   :  { %1229 = vsyncpa [#allocation7 + $0x1], 1 }
 0x440   :  { %1230 = vsyncpa [#allocation8], 1 }
 0x441   :  { %1232 = vsyncpa [#allocation8 + $0x1], 1 }

</bundles_post_ra>
